<compile_context>
chip_gen: v6e
topology: v6e:2x2x1
jax: 0.10.0
libtpu: 0.0.40
codegen_flags: <defaults>
</compile_context>

<pallas_src>
import functools

import jax
import jax.numpy as jnp
from jax import lax
from jax.experimental import pallas as pl
from jax.experimental.pallas import tpu as pltpu

CP = 128  # lane-padded channel width for weights / chained activations


# ---------------------------------------------------------------------------
# In-kernel im2col helpers (all shifts are zero-fill concats, hoisted per conv)
# ---------------------------------------------------------------------------
def _tap_phase(stride, d):
    """Map a 3x3 tap offset d in {0,1,2} to (phase, shift) for the given stride."""
    if stride == 1:
        return 0, d - 1
    return ((1, -1), (0, 0), (1, 0))[d]


def _shift_w(v, a_w, zcol):
    """Shift a (B, Hp, Wo, C) tensor along W by a_w with zero fill at the border."""
    if a_w == 0:
        return v
    if a_w < 0:          # result[..., j, :] = v[..., j-1, :] ; zero at j == 0
        return jnp.concatenate([zcol, v[:, :, :-1, :]], axis=2)
    # a_w > 0            # result[..., j, :] = v[..., j+1, :] ; zero at j == Wo-1
    return jnp.concatenate([v[:, :, 1:, :], zcol], axis=2)


def _im2col_slab(phases, stride, Ho, extra=None):
    """Build the K-packed (B, Ho, Wo, 9*C [+ extra]) activation slab for one conv.

    phases: dict[(p_h, p_w)] -> (B, Ho, Wo, C) phase tensors of the (virtual) input.
    Tap (dh, dw) of the stride-s conv with padding 1 is an UNshifted/once-shifted
    window of one phase; the W-shift variants are built once and reused (hoisted).
    """
    any_phase = next(iter(phases.values()))
    B, _, Wo, C = any_phase.shape
    dt = any_phase.dtype
    zrow = jnp.zeros((B, 1, Wo, C), dt)
    zcol = jnp.zeros((B, Ho + 2, 1, C), dt)
    hpad = {k: jnp.concatenate([zrow, v, zrow], axis=1) for k, v in phases.items()}

    memo, chunks = {}, []
    for dh in range(3):
        p_h, a_h = _tap_phase(stride, dh)
        for dw in range(3):
            p_w, a_w = _tap_phase(stride, dw)
            key = (p_h, p_w, a_w)
            if key not in memo:
                memo[key] = _shift_w(hpad[(p_h, p_w)], a_w, zcol)
            chunks.append(memo[key][:, 1 + a_h:1 + a_h + Ho, :, :])
    if extra is not None:
        chunks.append(extra)
    return jnp.concatenate(chunks, axis=-1)


# ---------------------------------------------------------------------------
# Fused BasicBlock kernel (B_blk samples per grid step)
# ---------------------------------------------------------------------------
def _basic_block_kernel(x_ref, w1_ref, b1_ref, w2_ref, b2_ref, o_ref, *,
                        stride, Ho, Wo, Cin, planes):
    f32, bf16 = jnp.float32, jnp.bfloat16
    B = x_ref.shape[0]
    M = B * Ho * Wo

    # Real-channel phase views of the input block (static lane slice; for the
    # stride-2 path the block already carries only the real Cin channels).
    xb = x_ref[...]
    if stride == 1:
        phases = {(0, 0): xb[:, 0, :, :, :Cin]}
    else:
        phases = {(p, q): xb[:, 2 * p + q, :, :, :Cin]
                  for p in (0, 1) for q in (0, 1)}

    # ---- conv1 (3x3, stride s) + folded BN1 + ReLU --------------------------
    # One K-packed MXU matmul: [M, 9*Cin] x [9*Cin, 128], f32 accumulation.
    slab1 = _im2col_slab(phases, stride, Ho).reshape(M, 9 * Cin)
    acc1 = jnp.dot(slab1, w1_ref[...], preferred_element_type=f32)
    h1 = jnp.maximum(acc1 + b1_ref[...], 0.0).astype(bf16)   # (M, 128), pad lanes == 0
    h1 = h1.reshape(B, Ho, Wo, CP)[..., :planes]              # stays in VMEM

    # ---- conv2 (3x3, stride 1) + folded BN2 + shortcut + ReLU ----------------
    # The shortcut source (identity input, or the option-'A' stride-2 subsample)
    # is exactly phase (0,0); it is appended to the slab and mapped to its output
    # lanes by identity rows folded into w2 — the add happens inside the matmul.
    slab2 = _im2col_slab({(0, 0): h1}, 1, Ho,
                         extra=phases[(0, 0)]).reshape(M, 9 * planes + Cin)
    acc2 = jnp.dot(slab2, w2_ref[...], preferred_element_type=f32)
    out = jnp.maximum(acc2 + b2_ref[...], 0.0)
    o_ref[...] = out.astype(bf16).reshape(B, Ho, Wo, CP)      # lane-dense bf16 store


# ---------------------------------------------------------------------------
# Wrapper: layout plumbing + pallas_call
# ---------------------------------------------------------------------------
def _pick_batch_block(n):
    """Largest divisor of n that is <= 8 while keeping >= 2 grid steps (v7x TCs).
    Sweep `batch_block` (8-32) for large batches."""
    if n <= 1:
        return 1
    best = 1
    for b in range(1, min(8, n // 2) + 1):
        if n % b == 0:
            best = b
    return best


def basic_block_apply_padded(x_pad, params, *, stride, in_planes, planes,
                             batch_block=None):
    """x_pad: (N, H, W, 128) bf16 NHWC, real channels in [:in_planes] (rest ignored).
    Returns (N, H//stride, W//stride, 128) bf16, real channels in [:planes]."""
    N, H, W, Cp = x_pad.shape
    assert Cp == CP and stride in (1, 2) and planes <= CP and in_planes <= CP
    if stride == 2:
        assert H % 2 == 0 and W % 2 == 0
    Ho, Wo = H // stride, W // stride
    assert Wo % 8 == 0, "W / stride must be a multiple of 8 (TPU sublane tile)"
    if not (stride == 1 and in_planes == planes):
        assert stride == 2 and in_planes + 2 * (planes // 4) == planes, \
            "only the standard CIFAR option-'A' downsample shortcut is supported"

    if stride == 1:
        # Free view; conv1 borders are handled in-kernel (no HBM pad pass).
        xph = x_pad[:, None]                                  # (N, 1, H, W, 128)
        P, Cb = 1, CP
    else:
        # Even/odd row x col phase split of the REAL channels, so every conv tap and
        # the option-'A' subsample are unstrided windows in-kernel (one extra XLA
        # pass, only at the two downsampling blocks of the network).
        xr = x_pad[..., :in_planes]
        xph = jnp.stack([xr[:, p::2, q::2, :] for p in (0, 1) for q in (0, 1)],
                        axis=1)                               # (N, 4, Ho, Wo, Cin)
        P, Cb = 4, in_planes

    bb = batch_block or _pick_batch_block(N)
    assert N % bb == 0

    kernel = functools.partial(_basic_block_kernel, stride=stride, Ho=Ho, Wo=Wo,
                               Cin=in_planes, planes=planes)
    k1 = 9 * in_planes
    k2 = 9 * planes + in_planes

    out = pl.pallas_call(
        kernel,
        out_shape=jax.ShapeDtypeStruct((N, Ho, Wo, CP), jnp.bfloat16),
        grid=(N // bb,),
        in_specs=[
            pl.BlockSpec((bb, P, Ho, Wo, Cb), lambda n: (n, 0, 0, 0, 0)),
            pl.BlockSpec((k1, CP), lambda n: (0, 0)),          # weights stay resident
            pl.BlockSpec((1, CP), lambda n: (0, 0)),
            pl.BlockSpec((k2, CP), lambda n: (0, 0)),
            pl.BlockSpec((1, CP), lambda n: (0, 0)),
        ],
        out_specs=pl.BlockSpec((bb, Ho, Wo, CP), lambda n: (n, 0, 0, 0)),
        compiler_params=pltpu.CompilerParams(
            dimension_semantics=("parallel",),                 # shard batch over TCs
            vmem_limit_bytes=48 * 1024 * 1024),
    )(xph, params["w1"], params["b1"], params["w2"], params["b2"])
    return out


def to_padded_nhwc(x_nchw):
    n, c, h, w = x_nchw.shape
    x = jnp.transpose(x_nchw, (0, 2, 3, 1)).astype(jnp.bfloat16)
    return jnp.pad(x, ((0, 0), (0, 0), (0, 0), (0, CP - c)))


def from_padded_nhwc(x_pad, planes):
    return jnp.transpose(x_pad[..., :planes], (0, 3, 1, 2)).astype(jnp.float32)


# ---------------------------------------------------------------------------
# Parameters: PyTorch-shaped init + eval-mode BN folding + kernel packing
# ---------------------------------------------------------------------------
def init_block_params(key, in_planes, planes):
    ks = jax.random.split(key, 4)

    def conv_w(k, cin, cout):                                  # He init
        std = (2.0 / (cin * 9)) ** 0.5
        return std * jax.random.normal(k, (cout, cin, 3, 3), jnp.float32)

    def bn(k, c):                                              # non-trivial stats
        kg, kb, km, kv = jax.random.split(k, 4)
        return (1.0 + 0.1 * jax.random.normal(kg, (c,), jnp.float32),
                0.1 * jax.random.normal(kb, (c,), jnp.float32),
                0.1 * jax.random.normal(km, (c,), jnp.float32),
                jax.random.uniform(kv, (c,), jnp.float32, minval=0.5, maxval=1.5))

    return {"conv1_w": conv_w(ks[0], in_planes, planes), "bn1": bn(ks[1], planes),
            "conv2_w": conv_w(ks[2], planes, planes), "bn2": bn(ks[3], planes)}


def fold_block_params(raw, *, stride, eps=1e-5):
    """Fold eval-mode BN into the conv weights and pack them for the kernel:
       w1: (9*Cin, 128) bf16       K = (tap, cin) row-major, Cout zero-padded to 128
       w2: (9*planes + Cin, 128)   conv2 taps + identity rows realising the shortcut
       b1, b2: (1, 128) f32        zero in padded lanes
    """
    planes, in_planes = raw["conv1_w"].shape[0], raw["conv1_w"].shape[1]

    def fold(w, gamma, beta, mean, var):
        scale = gamma * lax.rsqrt(var + eps)
        w_hwio = jnp.transpose(w * scale[:, None, None, None], (2, 3, 1, 0))
        return w_hwio, beta - mean * scale

    w1_hwio, b1 = fold(raw["conv1_w"], *raw["bn1"])
    w2_hwio, b2 = fold(raw["conv2_w"], *raw["bn2"])

    def pack(w_hwio):                                          # (3,3,Cin,Cout)->(9Cin,128)
        kh, kw, cin, cout = w_hwio.shape
        wp = jnp.pad(w_hwio.reshape(kh * kw * cin, cout), ((0, 0), (0, CP - cout)))
        return wp.astype(jnp.bfloat16)

    # Shortcut as identity rows appended to the conv2 weight: identity (offset 0) or
    # option-'A' channel zero-pad (offset planes//4). The add rides the conv2 matmul.
    off = 0 if (stride == 1 and in_planes == planes) else planes // 4
    eye = jnp.zeros((in_planes, CP), jnp.float32)
    eye = eye.at[jnp.arange(in_planes), off + jnp.arange(in_planes)].set(1.0)
    w2p = jnp.concatenate([pack(w2_hwio), eye.astype(jnp.bfloat16)], axis=0)

    def pad_b(b):
        return jnp.pad(b, (0, CP - planes)).reshape(1, CP).astype(jnp.float32)

    return {"w1": pack(w1_hwio), "b1": pad_b(b1), "w2": w2p, "b2": pad_b(b2),
            "w1_hwio": w1_hwio.astype(jnp.bfloat16),
            "w2_hwio": w2_hwio.astype(jnp.bfloat16),
            "b1_f32": b1, "b2_f32": b2}


# ---------------------------------------------------------------------------
# Pure-XLA reference at matching precision (bf16 inputs/weights, f32 accumulation)
# ---------------------------------------------------------------------------
def reference_basic_block(x_nchw, p, *, stride, in_planes, planes):
    x = jnp.transpose(x_nchw, (0, 2, 3, 1)).astype(jnp.bfloat16)
    dn = lax.conv_dimension_numbers(x.shape, p["w1_hwio"].shape,
                                    ("NHWC", "HWIO", "NHWC"))
    h = lax.conv_general_dilated(x, p["w1_hwio"], (stride, stride), ((1, 1), (1, 1)),
                                 dimension_numbers=dn,
                                 preferred_element_type=jnp.float32)
    h = jnp.maximum(h + p["b1_f32"], 0.0).astype(jnp.bfloat16)
    o = lax.conv_general_dilated(h, p["w2_hwio"], (1, 1), ((1, 1), (1, 1)),
                                 dimension_numbers=dn,
                                 preferred_element_type=jnp.float32)
    o = o + p["b2_f32"]
    if stride == 1 and in_planes == planes:
        sc = x.astype(jnp.float32)
    else:
        pad = planes // 4
        sc = jnp.pad(x[:, ::2, ::2, :].astype(jnp.float32),
                     ((0, 0), (0, 0), (0, 0), (pad, pad)))
    o = jnp.maximum(o + sc, 0.0).astype(jnp.bfloat16)          # match kernel output dtype
    return jnp.transpose(o.astype(jnp.float32), (0, 3, 1, 2))


# ---------------------------------------------------------------------------
if __name__ == "__main__":
    key = jax.random.PRNGKey(0)
    k_a, k_b, k_x = jax.random.split(key, 3)

    # Small deterministic input, NCHW like PyTorch: [batch=2, C=16, 16, 16].
    x = jax.random.normal(k_x, (2, 16, 16, 16), jnp.float32)

    # Two BasicBlock configurations exercising both shortcut paths:
    #   A: 16 -> 16, stride 1  -> identity shortcut
    #   B: 16 -> 32, stride 2  -> option-'A' shortcut (subsample + channel zero-pad)
    p_a = fold_block_params(init_block_params(k_a, 16, 16), stride=1)
    p_b = fold_block_params(init_block_params(k_b, 16, 32), stride=2)

    block_a = jax.jit(functools.partial(basic_block_apply_padded,
                                        stride=1, in_planes=16, planes=16))
    block_b = jax.jit(functools.partial(basic_block_apply_padded,
                                        stride=2, in_planes=16, planes=32))

    xa = to_padded_nhwc(x)              # NHWC bf16, channels padded to 128 (chain fmt)
    ya = block_a(xa, p_a)               # (2, 16, 16, 128) bf16
    yb = block_b(ya, p_b)               # (2, 8, 8, 128) bf16  (chained, no conversions)
    jax.block_until_ready(yb)

    out_a = from_padded_nhwc(ya, 16)    # (2, 16, 16, 16) f32 NCHW
    out_b = from_padded_nhwc(yb, 32)    # (2, 32, 8, 8) f32 NCHW
    assert out_a.shape == (2, 16, 16, 16) and out_a.dtype == jnp.float32
    assert out_b.shape == (2, 32, 8, 8) and out_b.dtype == jnp.float32

    # Correctness check against the XLA reference at matching (bf16) precision.
    ref_a = reference_basic_block(x, p_a, stride=1, in_planes=16, planes=16)
    ref_b = reference_basic_block(out_a, p_b, stride=2, in_planes=16, planes=32)

    def _close(got, ref):               # bf16 outputs: allow a couple of ulps
        return bool(jnp.all(jnp.abs(got - ref) <= 1e-2 + 2e-2 * jnp.abs(ref)))

    assert _close(out_a, ref_a), float(jnp.max(jnp.abs(out_a - ref_a)))
    assert _close(out_b, ref_b), float(jnp.max(jnp.abs(out_b - ref_b)))

    print("KERNEL_OK")
</pallas_src>

<mosaic_0001>
module attributes {stable_mosaic.version = 11 : i64} {
  func.func @_basic_block_kernel(%arg0: i32, %arg1: memref<1x1x16x16x128xbf16, #tpu.memory_space<vmem>>, %arg2: memref<144x128xbf16, #tpu.memory_space<vmem>>, %arg3: memref<1x128xf32, #tpu.memory_space<vmem>>, %arg4: memref<160x128xbf16, #tpu.memory_space<vmem>>, %arg5: memref<1x128xf32, #tpu.memory_space<vmem>>, %arg6: memref<1x16x16x128xbf16, #tpu.memory_space<vmem>>) attributes {dimension_semantics = [#tpu.dimension_semantics<parallel>], iteration_bounds = array<i64: 2>, scalar_prefetch = 0 : i64, scratch_operands = 0 : i64, tpu.core_type = #tpu.core_type<tc>, window_params = [{transform_indices = @transform_0, window_bounds = array<i64: 1, 1, 16, 16, 128>}, {pipeline_mode = #tpu.pipeline_mode<synchronous>, transform_indices = @transform_1, window_bounds = array<i64: 144, 128>}, {pipeline_mode = #tpu.pipeline_mode<synchronous>, transform_indices = @transform_2, window_bounds = array<i64: 1, 128>}, {pipeline_mode = #tpu.pipeline_mode<synchronous>, transform_indices = @transform_3, window_bounds = array<i64: 160, 128>}, {pipeline_mode = #tpu.pipeline_mode<synchronous>, transform_indices = @transform_4, window_bounds = array<i64: 1, 128>}, {transform_indices = @transform_5, window_bounds = array<i64: 1, 16, 16, 128>}]} {
    %c0 = arith.constant 0 : index
    %c0_0 = arith.constant 0 : index
    %c0_1 = arith.constant 0 : index
    %c0_2 = arith.constant 0 : index
    %c0_3 = arith.constant 0 : index
    %0 = vector.load %arg1[%c0, %c0_0, %c0_1, %c0_2, %c0_3] : memref<1x1x16x16x128xbf16, #tpu.memory_space<vmem>>, vector<1x1x16x16x128xbf16>
    %1 = vector.extract_strided_slice %0 {offsets = [0, 0, 0, 0, 0], sizes = [1, 1, 16, 16, 16], strides = [1, 1, 1, 1, 1]} : vector<1x1x16x16x128xbf16> to vector<1x1x16x16x16xbf16>
    %2 = vector.shape_cast %1 : vector<1x1x16x16x16xbf16> to vector<1x16x16x16xbf16>
    %cst = arith.constant 0.000000e+00 : bf16
    %3 = vector.broadcast %cst : bf16 to vector<1x1x16x16xbf16>
    %cst_4 = arith.constant 0.000000e+00 : bf16
    %4 = vector.broadcast %cst_4 : bf16 to vector<1x18x1x16xbf16>
    %5 = tpu.concatenate %3, %2, %3 in 1 : vector<1x1x16x16xbf16>, vector<1x16x16x16xbf16>, vector<1x1x16x16xbf16> -> vector<1x18x16x16xbf16>
    %6 = vector.extract_strided_slice %5 {offsets = [0, 0, 0, 0], sizes = [1, 18, 15, 16], strides = [1, 1, 1, 1]} : vector<1x18x16x16xbf16> to vector<1x18x15x16xbf16>
    %7 = tpu.concatenate %4, %6 in 2 : vector<1x18x1x16xbf16>, vector<1x18x15x16xbf16> -> vector<1x18x16x16xbf16>
    %8 = vector.extract_strided_slice %7 {offsets = [0, 0, 0, 0], sizes = [1, 16, 16, 16], strides = [1, 1, 1, 1]} : vector<1x18x16x16xbf16> to vector<1x16x16x16xbf16>
    %9 = vector.extract_strided_slice %5 {offsets = [0, 0, 0, 0], sizes = [1, 16, 16, 16], strides = [1, 1, 1, 1]} : vector<1x18x16x16xbf16> to vector<1x16x16x16xbf16>
    %10 = vector.extract_strided_slice %5 {offsets = [0, 0, 1, 0], sizes = [1, 18, 15, 16], strides = [1, 1, 1, 1]} : vector<1x18x16x16xbf16> to vector<1x18x15x16xbf16>
    %11 = tpu.concatenate %10, %4 in 2 : vector<1x18x15x16xbf16>, vector<1x18x1x16xbf16> -> vector<1x18x16x16xbf16>
    %12 = vector.extract_strided_slice %11 {offsets = [0, 0, 0, 0], sizes = [1, 16, 16, 16], strides = [1, 1, 1, 1]} : vector<1x18x16x16xbf16> to vector<1x16x16x16xbf16>
    %13 = vector.extract_strided_slice %7 {offsets = [0, 1, 0, 0], sizes = [1, 16, 16, 16], strides = [1, 1, 1, 1]} : vector<1x18x16x16xbf16> to vector<1x16x16x16xbf16>
    %14 = vector.extract_strided_slice %5 {offsets = [0, 1, 0, 0], sizes = [1, 16, 16, 16], strides = [1, 1, 1, 1]} : vector<1x18x16x16xbf16> to vector<1x16x16x16xbf16>
    %15 = vector.extract_strided_slice %11 {offsets = [0, 1, 0, 0], sizes = [1, 16, 16, 16], strides = [1, 1, 1, 1]} : vector<1x18x16x16xbf16> to vector<1x16x16x16xbf16>
    %16 = vector.extract_strided_slice %7 {offsets = [0, 2, 0, 0], sizes = [1, 16, 16, 16], strides = [1, 1, 1, 1]} : vector<1x18x16x16xbf16> to vector<1x16x16x16xbf16>
    %17 = vector.extract_strided_slice %5 {offsets = [0, 2, 0, 0], sizes = [1, 16, 16, 16], strides = [1, 1, 1, 1]} : vector<1x18x16x16xbf16> to vector<1x16x16x16xbf16>
    %18 = vector.extract_strided_slice %11 {offsets = [0, 2, 0, 0], sizes = [1, 16, 16, 16], strides = [1, 1, 1, 1]} : vector<1x18x16x16xbf16> to vector<1x16x16x16xbf16>
    %19 = tpu.concatenate %8, %9, %12, %13, %14, %15, %16, %17, %18 in 3 : vector<1x16x16x16xbf16>, vector<1x16x16x16xbf16>, vector<1x16x16x16xbf16>, vector<1x16x16x16xbf16>, vector<1x16x16x16xbf16>, vector<1x16x16x16xbf16>, vector<1x16x16x16xbf16>, vector<1x16x16x16xbf16>, vector<1x16x16x16xbf16> -> vector<1x16x16x144xbf16>
    %20 = vector.shape_cast %19 : vector<1x16x16x144xbf16> to vector<256x144xbf16>
    %c0_5 = arith.constant 0 : index
    %c0_6 = arith.constant 0 : index
    %21 = vector.load %arg2[%c0_5, %c0_6] : memref<144x128xbf16, #tpu.memory_space<vmem>>, vector<144x128xbf16>
    %cst_7 = arith.constant dense<0.000000e+00> : vector<256x128xf32>
    %22 = tpu.matmul %20, %21, %cst_7 {dimension_numbers = #tpu.dot_dimension_numbers<[1], [0], [0], [1], [0, 0, 1, 1], [], []>} : vector<256x144xbf16>, vector<144x128xbf16>, vector<256x128xf32> -> vector<256x128xf32>
    %c0_8 = arith.constant 0 : index
    %c0_9 = arith.constant 0 : index
    %23 = vector.load %arg3[%c0_8, %c0_9] : memref<1x128xf32, #tpu.memory_space<vmem>>, vector<1x128xf32>
    %24 = vector.broadcast %23 : vector<1x128xf32> to vector<256x128xf32>
    %25 = arith.addf %22, %24 : vector<256x128xf32>
    %cst_10 = arith.constant 0.000000e+00 : f32
    %26 = vector.broadcast %cst_10 : f32 to vector<256x128xf32>
    %27 = arith.maximumf %25, %26 : vector<256x128xf32>
    %28 = arith.truncf %27 : vector<256x128xf32> to vector<256x128xbf16>
    %29 = vector.shape_cast %28 : vector<256x128xbf16> to vector<1x16x16x128xbf16>
    %30 = vector.extract_strided_slice %29 {offsets = [0, 0, 0, 0], sizes = [1, 16, 16, 16], strides = [1, 1, 1, 1]} : vector<1x16x16x128xbf16> to vector<1x16x16x16xbf16>
    %cst_11 = arith.constant 0.000000e+00 : bf16
    %31 = vector.broadcast %cst_11 : bf16 to vector<1x1x16x16xbf16>
    %cst_12 = arith.constant 0.000000e+00 : bf16
    %32 = vector.broadcast %cst_12 : bf16 to vector<1x18x1x16xbf16>
    %33 = tpu.concatenate %31, %30, %31 in 1 : vector<1x1x16x16xbf16>, vector<1x16x16x16xbf16>, vector<1x1x16x16xbf16> -> vector<1x18x16x16xbf16>
    %34 = vector.extract_strided_slice %33 {offsets = [0, 0, 0, 0], sizes = [1, 18, 15, 16], strides = [1, 1, 1, 1]} : vector<1x18x16x16xbf16> to vector<1x18x15x16xbf16>
    %35 = tpu.concatenate %32, %34 in 2 : vector<1x18x1x16xbf16>, vector<1x18x15x16xbf16> -> vector<1x18x16x16xbf16>
    %36 = vector.extract_strided_slice %35 {offsets = [0, 0, 0, 0], sizes = [1, 16, 16, 16], strides = [1, 1, 1, 1]} : vector<1x18x16x16xbf16> to vector<1x16x16x16xbf16>
    %37 = vector.extract_strided_slice %33 {offsets = [0, 0, 0, 0], sizes = [1, 16, 16, 16], strides = [1, 1, 1, 1]} : vector<1x18x16x16xbf16> to vector<1x16x16x16xbf16>
    %38 = vector.extract_strided_slice %33 {offsets = [0, 0, 1, 0], sizes = [1, 18, 15, 16], strides = [1, 1, 1, 1]} : vector<1x18x16x16xbf16> to vector<1x18x15x16xbf16>
    %39 = tpu.concatenate %38, %32 in 2 : vector<1x18x15x16xbf16>, vector<1x18x1x16xbf16> -> vector<1x18x16x16xbf16>
    %40 = vector.extract_strided_slice %39 {offsets = [0, 0, 0, 0], sizes = [1, 16, 16, 16], strides = [1, 1, 1, 1]} : vector<1x18x16x16xbf16> to vector<1x16x16x16xbf16>
    %41 = vector.extract_strided_slice %35 {offsets = [0, 1, 0, 0], sizes = [1, 16, 16, 16], strides = [1, 1, 1, 1]} : vector<1x18x16x16xbf16> to vector<1x16x16x16xbf16>
    %42 = vector.extract_strided_slice %33 {offsets = [0, 1, 0, 0], sizes = [1, 16, 16, 16], strides = [1, 1, 1, 1]} : vector<1x18x16x16xbf16> to vector<1x16x16x16xbf16>
    %43 = vector.extract_strided_slice %39 {offsets = [0, 1, 0, 0], sizes = [1, 16, 16, 16], strides = [1, 1, 1, 1]} : vector<1x18x16x16xbf16> to vector<1x16x16x16xbf16>
    %44 = vector.extract_strided_slice %35 {offsets = [0, 2, 0, 0], sizes = [1, 16, 16, 16], strides = [1, 1, 1, 1]} : vector<1x18x16x16xbf16> to vector<1x16x16x16xbf16>
    %45 = vector.extract_strided_slice %33 {offsets = [0, 2, 0, 0], sizes = [1, 16, 16, 16], strides = [1, 1, 1, 1]} : vector<1x18x16x16xbf16> to vector<1x16x16x16xbf16>
    %46 = vector.extract_strided_slice %39 {offsets = [0, 2, 0, 0], sizes = [1, 16, 16, 16], strides = [1, 1, 1, 1]} : vector<1x18x16x16xbf16> to vector<1x16x16x16xbf16>
    %47 = tpu.concatenate %36, %37, %40, %41, %42, %43, %44, %45, %46, %2 in 3 : vector<1x16x16x16xbf16>, vector<1x16x16x16xbf16>, vector<1x16x16x16xbf16>, vector<1x16x16x16xbf16>, vector<1x16x16x16xbf16>, vector<1x16x16x16xbf16>, vector<1x16x16x16xbf16>, vector<1x16x16x16xbf16>, vector<1x16x16x16xbf16>, vector<1x16x16x16xbf16> -> vector<1x16x16x160xbf16>
    %48 = vector.shape_cast %47 : vector<1x16x16x160xbf16> to vector<256x160xbf16>
    %c0_13 = arith.constant 0 : index
    %c0_14 = arith.constant 0 : index
    %49 = vector.load %arg4[%c0_13, %c0_14] : memref<160x128xbf16, #tpu.memory_space<vmem>>, vector<160x128xbf16>
    %cst_15 = arith.constant dense<0.000000e+00> : vector<256x128xf32>
    %50 = tpu.matmul %48, %49, %cst_15 {dimension_numbers = #tpu.dot_dimension_numbers<[1], [0], [0], [1], [0, 0, 1, 1], [], []>} : vector<256x160xbf16>, vector<160x128xbf16>, vector<256x128xf32> -> vector<256x128xf32>
    %c0_16 = arith.constant 0 : index
    %c0_17 = arith.constant 0 : index
    %51 = vector.load %arg5[%c0_16, %c0_17] : memref<1x128xf32, #tpu.memory_space<vmem>>, vector<1x128xf32>
    %52 = vector.broadcast %51 : vector<1x128xf32> to vector<256x128xf32>
    %53 = arith.addf %50, %52 : vector<256x128xf32>
    %cst_18 = arith.constant 0.000000e+00 : f32
    %54 = vector.broadcast %cst_18 : f32 to vector<256x128xf32>
    %55 = arith.maximumf %53, %54 : vector<256x128xf32>
    %56 = arith.truncf %55 : vector<256x128xf32> to vector<256x128xbf16>
    %57 = vector.shape_cast %56 : vector<256x128xbf16> to vector<1x16x16x128xbf16>
    %c0_19 = arith.constant 0 : index
    %c0_20 = arith.constant 0 : index
    %c0_21 = arith.constant 0 : index
    %c0_22 = arith.constant 0 : index
    %58 = vector.load %arg6[%c0_19, %c0_20, %c0_21, %c0_22] : memref<1x16x16x128xbf16, #tpu.memory_space<vmem>>, vector<1x16x16x128xbf16>
    tpu.vector_store %arg6[%c0_19, %c0_20, %c0_21, %c0_22], %57 {strides = array<i32>} : memref<1x16x16x128xbf16, #tpu.memory_space<vmem>>, vector<1x16x16x128xbf16>,
    return
  }
  func.func @transform_0(%arg0: i32) -> (i32, i32, i32, i32, i32) {
    %c0_i32 = arith.constant 0 : i32
    %c0_i32_0 = arith.constant 0 : i32
    %c0_i32_1 = arith.constant 0 : i32
    %c0_i32_2 = arith.constant 0 : i32
    %c0_i32_3 = arith.constant 0 : i32
    return %arg0, %c0_i32, %c0_i32_0, %c0_i32_1, %c0_i32_2 : i32, i32, i32, i32, i32
  }
  func.func @transform_1(%arg0: i32) -> (i32, i32) {
    %c0_i32 = arith.constant 0 : i32
    %c0_i32_0 = arith.constant 0 : i32
    %c0_i32_1 = arith.constant 0 : i32
    return %c0_i32, %c0_i32_0 : i32, i32
  }
  func.func @transform_2(%arg0: i32) -> (i32, i32) {
    %c0_i32 = arith.constant 0 : i32
    %c0_i32_0 = arith.constant 0 : i32
    %c0_i32_1 = arith.constant 0 : i32
    return %c0_i32, %c0_i32_0 : i32, i32
  }
  func.func @transform_3(%arg0: i32) -> (i32, i32) {
    %c0_i32 = arith.constant 0 : i32
    %c0_i32_0 = arith.constant 0 : i32
    %c0_i32_1 = arith.constant 0 : i32
    return %c0_i32, %c0_i32_0 : i32, i32
  }
  func.func @transform_4(%arg0: i32) -> (i32, i32) {
    %c0_i32 = arith.constant 0 : i32
    %c0_i32_0 = arith.constant 0 : i32
    %c0_i32_1 = arith.constant 0 : i32
    return %c0_i32, %c0_i32_0 : i32, i32
  }
  func.func @transform_5(%arg0: i32) -> (i32, i32, i32, i32) {
    %c0_i32 = arith.constant 0 : i32
    %c0_i32_0 = arith.constant 0 : i32
    %c0_i32_1 = arith.constant 0 : i32
    %c0_i32_2 = arith.constant 0 : i32
    return %arg0, %c0_i32, %c0_i32_0, %c0_i32_1 : i32, i32, i32, i32
  }
}

</mosaic_0001>

<bundles_post_ra>
// kernel: basic_block_apply_padded.1
= control target key start
LH: loop header
LB: loop body
LE: loop exit
PB: predicated region body
PF: predicated region fallthrough
CT: control target
= control target key end

     0   :  { %10 = vsyncpa [#allocation3], 0  ;;  %s4746_s0 = inlined_call_operand.hbm [shape: bf16[2,1,16,16,128], index: 0, kind: input, shape index: {}]   ;;  %s4747_s1 = inlined_call_operand.hbm [shape: bf16[144,128], index: 1, kind: input, shape index: {}]   ;;  %s4748_s2 = inlined_call_operand.vmem [shape: f32[1,128], index: 2, kind: input, shape index: {}]   ;;  %s4749_s3 = inlined_call_operand.hbm [shape: bf16[160,128], index: 3, kind: input, shape index: {}]   ;;  %s4750_s4 = inlined_call_operand.vmem [shape: f32[1,128], index: 4, kind: input, shape index: {}]   ;;  %s4751_s5 = inlined_call_operand.hbm [shape: bf16[2,16,16,128], index: 5, kind: output, shape index: {}]  }
   0x1   :  { %12 = vsyncpa [#allocation3 + $0x1], 0 }
   0x2   :  { %13 = vsyncpa [#allocation6], 0 }
   0x3   :  { %14 = vsyncpa [#allocation4], 0 }
   0x4   :  { %16 = vsyncpa [#allocation4 + $0x1], 0  ;;  %s3360_s18 = smov 0   ;;  %s3362_s19 = smov 0  }
   0x5   :  { %s3364_s20 = smov 0   ;;  %s3366_s21 = smov 0  }
   0x6 LB: > { %s3381_s22 = sadd.s32 4294967295, %s3313_s21   ;;  %s2803_s23 = sadd.s32 4294967294, %s3313_s21   ;;  %s3313_s21 = sphi %s3366_s21, %s4778_s21   ;;  %s3309_s20 = sphi %s3364_s20, %s4777_s20   ;;  %s3305_s19 = sphi %s3362_s19, %s4776_s19   ;;  %s3301_s18 = sphi %s3360_s18, %s4775_s18  }
   0x7   : > { %p42_p0 = scmp.ne.s32.totalorder %s3305_s19, %s3301_s18  ;;  %p4752_p1 = scmp.eq.s32.totalorder %s3381_s22, 0 }
   0x8   : > { %p150_p2 = scmp.eq.s32.totalorder %s3381_s22, 1  ;;  %p156_p3 = scmp.eq.s32.totalorder %s2803_s23, 1 }
   0x9   : > { %p3390_p4 = por %p4752_p1, %p42_p0  ;;  %p2804_p5 = scmp.ge.s32.totalorder %s3313_s21, 1 }
   0xa   : > { %p3395_p6 = por %p156_p3, %p42_p0  ;;  %p163_p7 = scmp.lt.s32.totalorder %s3313_s21, 3 }
   0xb   : > { %s4757_s24 = scalar_select %p3390_p4, 1, 0 }
   0xc   : > { %s4758_s25 = scalar_select %p3395_p6, 1, 0 }
   0xd   : > { %p3400_p8 = pnand %p2804_p5, %p163_p7  ;;  %s3315_s27 = smov [#allocation5]  }
   0xe   : > { %s175_s28 = sshll.u32 %s3315_s27, 4  ;;  %s3316_s30 = smov [#allocation7]   ;;  %s176_s28 = int_to_ptr.vmem [resolvable:$true] %s175_s28 }
   0xf   : > { %s4759_s26 = scalar_select %p3400_p8, 1, 0 }
  0x10   : > { %p3063_p9 = pneg %p3400_p8  ;;  %s191_s6 = sshll.u32 %s3316_s30, 4  ;;  %s192_s6 = int_to_ptr.vmem [resolvable:$true] %s191_s6 }
  0x11   : > { %s3176_s7 = scalar_lea.vmem %s176_s28, 1152  ;;  %p3184_p5 = scmp.lt.s32.totalorder %s176_s28, %s176_s28 }
  0x12   : > { %p3409_p11 = pnand %p3063_p9, %p4752_p1  ;;  %p3177_p13 = scmp.ne.s32.totalorder %s176_s28, %s3176_s7 }
  0x13   : > { %p3185_p7 = scmp.lt.s32.totalorder %s3176_s7, %s3176_s7 }
  0x14   : > { %p3167_p12 = pneg %p3409_p11 }
  0x15   : > { %p3186_p10 = por %p3185_p7, %p3184_p5 }
  0x16   : > { %p3179_p0 = pnand %p3177_p13, %p3167_p12 }
  0x18   : > { %p3180_p3 = pneg %p3179_p0 }
  0x1a   : > { %p3187_p9 = pnand %p3186_p10, %p3180_p3 }
  0x1c   : > { %3190 = shalt.err (!%p3187_p9)
}
  0x1d   : > { %s4753_s8 = smov 64   ;;  %s3318_s9 = smov 4  }
  0x1e   : > { %3066 = dma.hbm_to_vmem [thread:$0]  (!%p3409_p11), %s4747_s1, 1152, %s176_s28, [#allocation6], %s4753_s8, %s4753_s8, %s3318_s9  }
  0x1f   : > { %s3202_s12 = scalar_lea.vmem %s192_s6, 1280  ;;  %p3210_p10 = scmp.lt.s32.totalorder %s192_s6, %s192_s6 }
  0x20   : > { %p3203_p13 = scmp.ne.s32.totalorder %s192_s6, %s3202_s12  ;;  %p3211_p3 = scmp.lt.s32.totalorder %s3202_s12, %s3202_s12 }
  0x22   : > { %p3205_p0 = pnand %p3203_p13, %p3167_p12  ;;  %p3212_p7 = por %p3211_p3, %p3210_p10 }
  0x24   : > { %p3206_p5 = pneg %p3205_p0 }
  0x26   : > { %p3213_p9 = pnand %p3212_p7, %p3206_p5 }
  0x28   : > { %3216 = shalt.err (!%p3213_p9)
}
  0x29   : > { %3069 = dma.hbm_to_vmem [thread:$0]  (!%p3409_p11), %s4749_s3, 1280, %s192_s6, [#allocation6], %s4753_s8, %s4753_s8, %s3318_s9  }
  0x2a   : > { %s3438_s15 = sadd.s32 1, %s3313_s21   ;;  %s29_s16 = sadd.s32 1, %s3309_s20 }
  0x2b   : > { %s26_s17 = ssub.s32 %s3313_s21, %s3438_s15  ;;  %p36_p12 = scmp.ne.s32.totalorder %s3309_s20, %s3305_s19 }
  0x2c   : > { %p27_p13 = scmp.eq.s32.totalorder %s26_s17, 0  ;;  %p37_p0 = scmp.eq.s32.totalorder %s3313_s21, 0 }
  0x2d   : > { %p3448_p5 = por %p150_p2, %p36_p12  ;;  %p3080_p10 = scmp.lt.s32.totalorder %s3313_s21, 2 }
  0x2e   : > { %s3454_s27 = scalar_select %p27_p13, %s3309_s20, %s29_s16  }
  0x2f   : > { %s4761_s23 = scalar_select %p3448_p5, 1, 0 }
  0x30   : > { %p38_p3 = por %p37_p0, %p36_p12  ;;  %s208_s28 = sand.u32 1, %s3309_s20  }
  0x31   : > { %s2808_s29 = sshll.u32 %s208_s28, 7  ;;  %s2922_s30 = sshll.u32 %s3313_s21, 11 }
  0x32   : > { %s3461_s10 = scalar_lea.hbm %s4746_s0, %s2922_s30  ;;  %s212_s11 = scalar_lea.vmem [#allocation2], %s2808_s29 }
  0x33   : > { %s219_s12 = sshll.u32 %s212_s11, 4  ;;  %p3465_p2 = pnand %p3080_p10, %p38_p3  ;;  %s3463_s12 = int_to_ptr.vmem [resolvable:$true] %s219_s12 }
  0x34   : > { %s3469_s14 = scalar_lea.sflag [#allocation3], %s208_s28  ;;  %s3217_s16 = scalar_lea.hbm %s3461_s10, 2048 }
  0x35   : > { %p3218_p11 = scmp.ne.s32.totalorder %s3461_s10, %s3217_s16  ;;  %p3219_p7 = pneg %p3465_p2 }
  0x36   : > { %s3222_s29 = scalar_lea.hbm %s4746_s0, 4096  ;;  %p3223_p13 = scmp.lt.s32.totalorder %s3461_s10, %s4746_s0 }
  0x37   : > { %p3220_p9 = pnand %p3219_p7, %p3218_p11  ;;  %p3224_p0 = scmp.lt.s32.totalorder %s3222_s29, %s3217_s16 }
  0x39   : > { %p3221_p12 = pneg %p3220_p9  ;;  %p3225_p10 = por %p3224_p0, %p3223_p13 }
  0x3b   : > { %p3226_p3 = pnand %p3225_p10, %p3221_p12 }
  0x3d   : > { %3229 = shalt.err (!%p3226_p3)
}
  0x3e   : > { %s3230_s28 = scalar_lea.vmem %s3463_s12, 2048  ;;  %s3319_s11 = smov [#allocation2]  }
  0x3f   : > { %p3231_p1 = scmp.ne.s32.totalorder %s3463_s12, %s3230_s28  ;;  %s3235_s8 = sshll.u32 %s3319_s11, 4  ;;  %s3236_s8 = int_to_ptr.vmem [resolvable:$false] %s3235_s8 }
  0x40   : > { %s3237_s17 = scalar_lea.vmem %s3236_s8, 4096  ;;  %p3238_p9 = scmp.lt.s32.totalorder %s3463_s12, %s3236_s8 }
  0x41   : > { %p3233_p6 = pnand %p3231_p1, %p3219_p7  ;;  %p3239_p5 = scmp.lt.s32.totalorder %s3237_s17, %s3230_s28 }
  0x43   : > { %p3234_p11 = pneg %p3233_p6  ;;  %p3240_p4 = por %p3239_p5, %p3238_p9 }
  0x45   : > { %p3241_p8 = pnand %p3240_p4, %p3234_p11 }
  0x47   : > { %3244 = shalt.err (!%p3241_p8)
}
  0x48   : > { %s4763_s16 = smov 64   ;;  %p4764_p1 = scmp.ne.s32.totalorder %s4759_s26, 0 }
  0x49   : > { %3073 = dma.hbm_to_vmem [thread:$0]  (!%p3465_p2), %s3461_s10, 2048, %s3463_s12, %s3469_s14, %s4763_s16, %s4763_s16, %s3318_s9  }
  0x4a   : > { %231 = sbr.rel (%p4764_p1) target bundleno = 976 (0x3d0), region = 40  ;;  %s3496_s30 = sand.u32 (!%p4764_p1), 1, %s3305_s19  }
  0x4b   : > { %s2812_s8 = sshll.u32 (!%p4764_p1), %s3496_s30, 7  ;;  %s234_s29 = scalar_lea.sflag (!%p4764_p1), [#allocation3], %s3496_s30 }
  0x4c   : > { %s3502_s13 = scalar_lea.vmem (!%p4764_p1), [#allocation2], %s2812_s8  ;;  %p4765_p4 = scmp.ne.s32.totalorder (!%p4764_p1), %s4757_s24, 0 }
  0x4f   : > { %3288 = dma.done.wait (%p4765_p4), %s234_s29, 2048  }
  0x50   : > { %3290 = vsyncadd (%p4765_p4), %s234_s29, 4294965248  ;;  %p4766_p6 = scmp.eq.s32.totalorder %s3381_s22, 0 }
  0x52   : > { %3292 = dma.done.wait (%p4766_p6), [#allocation6], 2432   ;;  %p4767_p8 = pmov %p4766_p6 }
  0x53   : > { %vm592_vm0 = vcmask 1047552   ;;  %v3320_v0 = vmov 0   ;;  %s3321_s26 = smov 16   ;;  %vm593_vm1 = vsmask.f32 7424  ;;  %s3322_s24 = smov 32  }
  0x54   : > { %3294 = vsyncadd (%p4767_p8), [#allocation6], 4294964864  ;;  %613 = vrot.lane.b32.xlu0 %v3320_v0, %s3321_s26  ;;  %v541_v1 = vrot.slane %v3320_v0, 1  ;;  %1261 = vmatprep.subr.bf16.mxu0 %v3320_v0  ;;  %vm522_vm3 = vsmask.f32 256  ;;  %v3129_v4 = vld [vmem:[%s3502_s13] sm:$0xff]  }
  0x55   : > { %vm3516_vm2 = vmand %vm592_vm0, %vm593_vm1  ;;  %2344 = vmatprep.subr.bf16.mxu1 %v3320_v0  ;;  %v3130_v5 = vld [vmem:[%s3502_s13 + $0x8] sm:$0xff]   ;;  %vm521_vm4 = vcmask 1040384   ;;  %s3323_s9 = smov 64   ;;  %v393_v6 = vshrl.u32 %v3129_v4, 16  ;;  %v396_v7 = vshll.u32 %v3129_v4, 16  ;;  %s3324_s10 = smov 112  }
  0x56   : > { %v3523_v3 = vsel %vm3516_vm2, %v541_v1, 0  ;;  %741 = vrot.lane.b32.xlu1 %v3129_v4, %s3323_s9  ;;  %v400_v8 = vshrl.u32 %v3130_v5, 16  ;;  %v403_v9 = vshll.u32 %v3130_v5, 16  ;;  %v3532_v10 = vld [vmem:[%s3502_s13 + $0x10] sm:$0xff]   ;;  %vm3535_vm5 = vmand %vm521_vm4, %vm522_vm3  ;;  %s3325_s12 = smov 80   ;;  %vm871_vm6 = vcmask 130048  }
  0x57   : > { %v543_v11 = vrot.slane %v396_v7, 1  ;;  %v395_v12 = vrot.slane %v393_v6, 7  ;;  %v407_v18 = vshrl.u32 %v3532_v10, 16  ;;  %s3326_s14 = smov 48   ;;  %v410_v25 = vshll.u32 %v3532_v10, 16  ;;  %v3137_v27 = vld [vmem:[#allocation5 + $0x38] sm:$0xff]  }
  0x58   : > { %661 = vrot.lane.b32.xlu0 %v3523_v3, %s3322_s24  ;;  %v402_v14 = vrot.slane %v400_v8, 7  ;;  %v545_v15 = vrot.slane %v403_v9, 1  ;;  %s3327_s6 = smov 96   ;;  %1262 = vmatpush1.bf16.msra.mxu0 %v3137_v27  ;;  %v3138_v29 = vld [vmem:[#allocation5 + $0x30] sm:$0xff]   ;;  %v3139_v31 = vld [vmem:[#allocation5 + $0x28] sm:$0xff]   ;;  %v3132_v32 = vld [vmem:[%s3502_s13 + $0x18] sm:$0xff]  }
  0x59   : > { %v544_v16 = vor.u32 %v543_v11, %v393_v6  ;;  %v398_v17 = vor.u32 %v396_v7, %v395_v12  ;;  %v409_v24 = vrot.slane %v407_v18, 7  ;;  %1263 = vmatprep.subr.bf16.mxu0 %v3320_v0  ;;  %v547_v33 = vrot.slane %v410_v25, 1  ;;  %v3141_v34 = vld [vmem:[#allocation5 + $0x20] sm:$0xff]   ;;  %v3142_v37 = vld [vmem:[#allocation5 + $0x18] sm:$0xff]   ;;  %v3143_v42 = vld [vmem:[#allocation5 + $0x10] sm:$0xff]   ;;  %s4639_s16 = scalar_lea.vmem [#allocation8], %s2812_s8 }
  0x5a   : > { %615 = vrot.lane.b32.xlu1 %v3129_v4, %s3321_s26  ;;  %v405_v19 = vor.u32 %v403_v9, %v402_v14  ;;  %v546_v20 = vor.u32 %v545_v15, %v400_v8  ;;  %v414_v35 = vshrl.u32 %v3132_v32, 16  ;;  %v417_v39 = vshll.u32 %v3132_v32, 16  ;;  %v3133_v40 = vld [vmem:[%s3502_s13 + $0x20] sm:$0xff]   ;;  %v3144_v46 = vld [vmem:[#allocation5 + $0x8] sm:$0xff]   ;;  %v3135_v63 = vld [vmem:[%s3502_s13 + $0x30] sm:$0xff]   ;;  %s2955_s8 = sshll.u32 %s3381_s22, 11 }
  0x5b   : > { %v596_v21 = vsel %vm3516_vm2, %v544_v16, 0  ;;  %v3545_v22 = vsel %vm3535_vm5, 0, %v398_v17  ;;  %v412_v28 = vor.u32 %v410_v25, %v409_v24  ;;  %v548_v36 = vor.u32 %v547_v33, %v407_v18  ;;  %v3146_v50 = vld [vmem:[#allocation5] sm:$0xff]   ;;  %v3134_v56 = vld [vmem:[%s3502_s13 + $0x28] sm:$0xff]   ;;  %v3136_v14 = vld [vmem:[%s3502_s13 + $0x38] sm:$0xff]   ;;  %s2711_s29 = sshll.u32 %s4639_s16, 4  ;;  %s4700_s29 = int_to_ptr.vmem [resolvable:$true] %s2711_s29 }
  0x5c   : > { %839 = vrot.lane.b32.xlu0 %v3130_v5, %s3324_s10  ;;  %v597_v23 = vsel %vm3516_vm2, %v546_v20, 0  ;;  %v3556_v26 = vsel %vm3535_vm5, 0, %v405_v19  ;;  %1264 = vmatpush1.bf16.msra.mxu0 %v3138_v29  ;;  %v416_v38 = vrot.slane %v414_v35, 7  ;;  %v421_v44 = vshrl.u32 %v3133_v40, 16  ;;  %v3147_v52 = vld [vmem:[#allocation5 + $0x40] sm:$0xff]   ;;  %p4772_p2 = scmp.ne.s32.totalorder %s4761_s23, 0 }
  0x5d   : > { %2842 = vmatprep.mubr.msk.bf16.mxu0 %vm871_vm6, %v597_v23  ;;  %v3567_v30 = vsel %vm3535_vm5, 0, %v412_v28  ;;  %1265 = vmatprep.subr.bf16.mxu0 %v3320_v0  ;;  %v3585_v41 = vsel %vm3516_vm2, %v548_v36, 0  ;;  %v549_v45 = vrot.slane %v417_v39, 1  ;;  %v424_v48 = vshll.u32 %v3133_v40, 16  ;;  %s3328_s22 = smov [#allocation8]  }
  0x5e   : > { %709 = vrot.lane.b32.xlu1 %v3545_v22, %s3326_s14  ;;  %v419_v43 = vor.u32 %v417_v39, %v416_v38  ;;  %v423_v49 = vrot.slane %v421_v44, 7  ;;  %v428_v58 = vshrl.u32 %v3134_v56, 16  ;;  %v431_v61 = vshll.u32 %v3134_v56, 16 }
  0x5f   : > { %v550_v53 = vor.u32 %v549_v45, %v414_v35  ;;  %v551_v57 = vrot.slane %v424_v48, 1  ;;  %v435_v4 = vshrl.u32 %v3135_v63, 16  ;;  %v438_v7 = vshll.u32 %v3135_v63, 16  ;;  %v3698_v35 = vld [vmem:[%s3502_s13 + $0x48] sm:$0xff]  }
  0x60   : > { %774 = vrot.lane.b32.xlu0 %v596_v21, %s3325_s12  ;;  %1266 = vmatpush1.bf16.msra.mxu0 %v3139_v31  ;;  %v3594_v47 = vsel %vm3535_vm5, 0, %v419_v43  ;;  %v426_v51 = vor.u32 %v424_v48, %v423_v49  ;;  %v430_v60 = vrot.slane %v428_v58, 7  ;;  %v553_v8 = vrot.slane %v431_v61, 1 }
  0x61   : > { %1267 = vmatprep.subr.bf16.mxu0 %v3320_v0  ;;  %v3615_v55 = vsel %vm3516_vm2, %v550_v53, 0  ;;  %v552_v59 = vor.u32 %v551_v57, %v421_v44  ;;  %v437_v6 = vrot.slane %v435_v4, 7  ;;  %v555_v15 = vrot.slane %v438_v7, 1 }
  0x62   : > { %807 = vrot.lane.b32.xlu1 %v3556_v26, %s3327_s6  ;;  %v3611_v54 = vsel %vm3535_vm5, 0, %v426_v51  ;;  %v433_v1 = vor.u32 %v431_v61, %v430_v60  ;;  %v442_v16 = vshrl.u32 %v3136_v14, 16  ;;  %v445_v19 = vshll.u32 %v3136_v14, 16 }
  0x63   : > { %v3630_v62 = vsel %vm3516_vm2, %v552_v59, 0  ;;  %v440_v9 = vor.u32 %v438_v7, %v437_v6  ;;  %v556_v17 = vor.u32 %v555_v15, %v435_v4  ;;  %v388_v44 = vrot.slane %v3320_v0, 7 }
  0x64   : > { %663 = vrot.lane.b32.xlu0 %v596_v21, %s3322_s24  ;;  %1268 = vmatpush1.bf16.msra.mxu0 %v3141_v34  ;;  %v444_v18 = vrot.slane %v442_v16, 7  ;;  %v3140_v21 = vld [vmem:[%s3502_s13 + $0x40] sm:$0xff]   ;;  %v557_v29 = vrot.slane %v445_v19, 1  ;;  %vm920_vm7 = vcmask 261120   ;;  %vm953_vm8 = vcmask 392192  }
  0x65   : > { %1269 = vmatprep.subr.bf16.mxu0 %v3320_v0  ;;  %v3651_v11 = vsel %vm3535_vm5, 0, %v440_v9  ;;  %v3670_v20 = vsel %vm3516_vm2, %v556_v17, 0  ;;  %v449_v24 = vshrl.u32 %v3140_v21, 16  ;;  %v452_v28 = vshll.u32 %v3140_v21, 16 }
  0x66   : > { %711 = vrot.lane.b32.xlu1 %v3556_v26, %s3326_s14  ;;  %v3724_v51 = vsel %vm3535_vm5, 0, %v388_v44  ;;  %vm986_vm9 = vcmask 523264   ;;  %vm1019_vm10 = vcmask 654336   ;;  %vm1052_vm11 = vcmask 785408  }
  0x67   : > { %v451_v27 = vrot.slane %v449_v24, 7  ;;  %v559_v36 = vrot.slane %v452_v28, 1  ;;  %vm1085_vm12 = vcmask 916480  }
  0x68   : > { %743 = vrot.lane.b32.xlu0 %v3130_v5, %s3323_s9  ;;  %1270 = vmatpush1.bf16.msra.mxu0 %v3142_v37  ;;  %v456_v37 = vshrl.u32 %v3698_v35, 16 }
  0x69   : > { %1271 = vmatprep.subr.bf16.mxu0 %v3320_v0  ;;  %v454_v31 = vor.u32 %v452_v28, %v451_v27  ;;  %v560_v39 = vor.u32 %v559_v36, %v449_v24 }
  0x6a   : > { %776 = vrot.lane.b32.xlu1 %v597_v23, %s3325_s12 }
  0x6b   : > { %v3691_v33 = vsel %vm3535_vm5, 0, %v454_v31  ;;  %v3715_v45 = vsel %vm3516_vm2, %v560_v39, 0 }
  0x6c   : > { %809 = vrot.lane.b32.xlu0 %v3567_v30, %s3327_s6  ;;  %1272 = vmatpush1.bf16.msra.mxu0 %v3143_v42  ;;  %v459_v42 = vshll.u32 %v3698_v35, 16 }
  0x6d   : > { %1273 = vmatprep.subr.bf16.mxu0 %v3320_v0 }
  0x6e   : > { %841 = vrot.lane.b32.xlu1 %v3532_v10, %s3324_s10  ;;  %v561_v61 = vrot.slane %v459_v42, 1 }
  0x70   : > { %617 = vrot.lane.b32.xlu0 %v3130_v5, %s3321_s26  ;;  %1274 = vmatpush1.bf16.msra.mxu0 %v3144_v46  ;;  %v3638_v5 = vsel %vm3535_vm5, 0, %v433_v1  ;;  %v3718_v46 = vld [vmem:[%s3502_s13 + $0x50] sm:$0xff]  }
  0x71   : > { %1275 = vmatprep.subr.bf16.mxu0 %v3320_v0  ;;  %v466_v59 = vshll.u32 %v3718_v46, 16 }
  0x72   : > { %665 = vrot.lane.b32.xlu1 %v597_v23, %s3322_s24  ;;  %v447_v23 = vor.u32 %v445_v19, %v444_v18 }
  0x74   : > { %713 = vrot.lane.b32.xlu0 %v3567_v30, %s3326_s14  ;;  %1276 = vmatpush1.bf16.msra.mxu0 %v3146_v50  ;;  %v3678_v25 = vsel %vm3535_vm5, 0, %v447_v23  ;;  %v3769_v23 = vld [vmem:[%s3502_s13 + $0x58] sm:$0xff]  }
  0x75   : > { %1291 = vmatprep.subr.bf16.mxu0 %v3320_v0  ;;  %v470_v31 = vshrl.u32 %v3769_v23, 16 }
  0x76   : > { %745 = vrot.lane.b32.xlu1 %v3532_v10, %s3323_s9 }
  0x77   : > { %v472_v39 = vrot.slane %v470_v31, 7 }
  0x78   : > { %778 = vrot.lane.b32.xlu0 %v3585_v41, %s3325_s12  ;;  %1292 = vmatpush2.bf16.msra.mxu0 %v3147_v52  ;;  %v463_v52 = vshrl.u32 %v3718_v46, 16 }
  0x7a   : > { %811 = vrot.lane.b32.xlu1 %v3594_v47, %s3327_s6 }
  0x7c   : > { %843 = vrot.lane.b32.xlu0 %v3132_v32, %s3324_s10 }
  0x7e   : > { %619 = vrot.lane.b32.xlu1 %v3532_v10, %s3321_s26  ;;  %v554_v10 = vor.u32 %v553_v8, %v428_v58  ;;  %v465_v58 = vrot.slane %v463_v52, 7 }
  0x80   : > { %667 = vrot.lane.b32.xlu0 %v3585_v41, %s3322_s24  ;;  %v3655_v12 = vsel %vm3516_vm2, %v554_v10, 0  ;;  %v468_v7 = vor.u32 %v466_v59, %v465_v58  ;;  %v562_v10 = vor.u32 %v561_v61, %v456_v37 }
  0x82   : > { %715 = vrot.lane.b32.xlu1 %v3594_v47, %s3326_s14  ;;  %v3759_v17 = vsel %vm3535_vm5, 0, %v468_v7 }
  0x84   : > { %747 = vrot.lane.b32.xlu0 %v3132_v32, %s3323_s9 }
  0x86   : > { %780 = vrot.lane.b32.xlu1 %v3615_v55, %s3325_s12 }
  0x88   : > { %813 = vrot.lane.b32.xlu0 %v3611_v54, %s3327_s6 }
  0x8a   : > { %845 = vrot.lane.b32.xlu1 %v3133_v40, %s3324_s10 }
  0x8c   : > { %621 = vrot.lane.b32.xlu0 %v3132_v32, %s3321_s26  ;;  %v558_v32 = vor.u32 %v557_v29, %v442_v16 }
  0x8e   : > { %669 = vrot.lane.b32.xlu1 %v3615_v55, %s3322_s24  ;;  %v3695_v34 = vsel %vm3516_vm2, %v558_v32, 0 }
  0x90   : > { %717 = vrot.lane.b32.xlu0 %v3611_v54, %s3326_s14 }
  0x92   : > { %749 = vrot.lane.b32.xlu1 %v3133_v40, %s3323_s9 }
  0x94   : > { %782 = vrot.lane.b32.xlu0 %v3630_v62, %s3325_s12 }
  0x96   : > { %815 = vrot.lane.b32.xlu1 %v3638_v5, %s3327_s6 }
  0x98   : > { %847 = vrot.lane.b32.xlu0 %v3134_v56, %s3324_s10 }
  0x9a   : > { %623 = vrot.lane.b32.xlu1 %v3133_v40, %s3321_s26  ;;  %v458_v40 = vrot.slane %v456_v37, 7 }
  0x9c   : > { %671 = vrot.lane.b32.xlu0 %v3630_v62, %s3322_s24  ;;  %v461_v48 = vor.u32 %v459_v42, %v458_v40  ;;  %v473_v40 = vshll.u32 %v3769_v23, 16 }
  0x9e   : > { %719 = vrot.lane.b32.xlu1 %v3638_v5, %s3326_s14  ;;  %v3730_v53 = vsel %vm3535_vm5, 0, %v461_v48  ;;  %v3800_v48 = vld [vmem:[%s3502_s13 + $0x60] sm:$0xff]  }
  0xa0   : > { %751 = vrot.lane.b32.xlu0 %v3134_v56, %s3323_s9 }
  0xa2   : > { %784 = vrot.lane.b32.xlu1 %v3655_v12, %s3325_s12 }
  0xa4   : > { %817 = vrot.lane.b32.xlu0 %v3651_v11, %s3327_s6 }
  0xa6   : > { %849 = vrot.lane.b32.xlu1 %v3135_v63, %s3324_s10 }
  0xa8   : > { %625 = vrot.lane.b32.xlu0 %v3134_v56, %s3321_s26 }
  0xaa   : > { %673 = vrot.lane.b32.xlu1 %v3655_v12, %s3322_s24 }
  0xac   : > { %721 = vrot.lane.b32.xlu0 %v3651_v11, %s3326_s14 }
  0xae   : > { %753 = vrot.lane.b32.xlu1 %v3135_v63, %s3323_s9 }
  0xb0   : > { %786 = vrot.lane.b32.xlu0 %v3670_v20, %s3325_s12 }
  0xb2   : > { %819 = vrot.lane.b32.xlu1 %v3678_v25, %s3327_s6 }
  0xb4   : > { %851 = vrot.lane.b32.xlu0 %v3136_v14, %s3324_s10 }
  0xb6   : > { %627 = vrot.lane.b32.xlu1 %v3135_v63, %s3321_s26 }
  0xb8   : > { %675 = vrot.lane.b32.xlu0 %v3670_v20, %s3322_s24 }
  0xba   : > { %723 = vrot.lane.b32.xlu1 %v3678_v25, %s3326_s14 }
  0xbc   : > { %755 = vrot.lane.b32.xlu0 %v3136_v14, %s3323_s9 }
  0xbe   : > { %788 = vrot.lane.b32.xlu1 %v3695_v34, %s3325_s12 }
  0xc0   : > { %821 = vrot.lane.b32.xlu0 %v3691_v33, %s3327_s6 }
  0xc2   : > { %853 = vrot.lane.b32.xlu1 %v3140_v21, %s3324_s10 }
  0xc4   : > { %629 = vrot.lane.b32.xlu0 %v3136_v14, %s3321_s26 }
  0xc6   : > { %v614_v38 = vpop.permute.xlu0 %613  ;;  %677 = vrot.lane.b32.xlu1 %v3695_v34, %s3322_s24 }
  0xc7   : > { %v874_v57 = vsel %vm871_vm6, %v3724_v51, %v614_v38 }
  0xc8   : > { %725 = vrot.lane.b32.xlu0 %v3691_v33, %s3326_s14  ;;  %v742_v49 = vpop.permute.xlu1 %741 }
  0xca   : > { %v662_v43 = vpop.permute.xlu0 %661  ;;  %757 = vrot.lane.b32.xlu1 %v3140_v21, %s3323_s9 }
  0xcb   : > { %v3742_v63 = vsel %vm920_vm7, %v874_v57, %v662_v43 }
  0xcc   : > { %790 = vrot.lane.b32.xlu0 %v3715_v45, %s3325_s12  ;;  %v3732_v56 = vpop.permute.xlu1 %615 }
  0xcd   : > { %v877_v18 = vsel %vm871_vm6, %v3545_v22, %v3732_v56  ;;  %v563_v22 = vrot.slane %v466_v59, 1  ;;  %v477_v59 = vshrl.u32 %v3800_v48, 16 }
  0xce   : > { %v840_v50 = vpop.permute.xlu0 %839  ;;  %823 = vrot.lane.b32.xlu1 %v3730_v53, %s3327_s6 }
  0xd0   : > { %855 = vrot.lane.b32.xlu0 %v3698_v35, %s3324_s10  ;;  %v710_v1 = vpop.permute.xlu1 %709 }
  0xd1   : > { %v955_v4 = vsel %vm953_vm8, %v3742_v63, %v710_v1 }
  0xd2   : > { %v775_v60 = vpop.permute.xlu0 %774  ;;  %v988_v6 = vsel %vm986_vm9, %v955_v4, %v742_v49  ;;  %631 = vrot.lane.b32.xlu1 %v3140_v21, %s3321_s26  ;;  %v3766_v21 = vsel %vm3516_vm2, %v562_v10, 0  ;;  %v479_v4 = vrot.slane %v477_v59, 7 }
  0xd3   : > { %v1021_v9 = vsel %vm1019_vm10, %v988_v6, %v775_v60  ;;  %v480_v6 = vshll.u32 %v3800_v48, 16 }
  0xd4   : > { %679 = vrot.lane.b32.xlu0 %v3715_v45, %s3322_s24  ;;  %v808_v14 = vpop.permute.xlu1 %807 }
  0xd5   : > { %v1054_v15 = vsel %vm1052_vm11, %v1021_v9, %v808_v14 }
  0xd6   : > { %v664_v8 = vpop.permute.xlu0 %663  ;;  %727 = vrot.lane.b32.xlu1 %v3730_v53, %s3326_s14  ;;  %v1087_v16 = vsel %vm1085_vm12, %v1054_v15, %v840_v50  ;;  %v475_v50 = vor.u32 %v473_v40, %v472_v39 }
  0xd7   : > { %1294 = vmatmul.mubr.bf16.vlgmr.msra.gmra.mxu0 %v1087_v16  ;;  %v924_v24 = vsel %vm920_vm7, %v877_v18, %v664_v8  ;;  %v565_v8 = vrot.slane %v473_v40, 1  ;;  %v482_v16 = vor.u32 %v480_v6, %v479_v4 }
  0xd8   : > { %759 = vrot.lane.b32.xlu0 %v3698_v35, %s3323_s9  ;;  %v712_v27 = vpop.permute.xlu1 %711  ;;  %2843 = vmatprep.mubr.msk.bf16.mxu0 %vm871_vm6, %v3585_v41  ;;  %v564_v41 = vor.u32 %v563_v22, %v463_v52  ;;  %v3815_v61 = vsel %vm3535_vm5, 0, %v475_v50 }
  0xd9   : > { %v957_v28 = vsel %vm953_vm8, %v924_v24, %v712_v27 }
  0xda   : > { %v744_v19 = vpop.permute.xlu0 %743  ;;  %792 = vrot.lane.b32.xlu1 %v3766_v21, %s3325_s12 }
  0xdb   : > { %v990_v32 = vsel %vm986_vm9, %v957_v28, %v744_v19  ;;  %v566_v19 = vor.u32 %v565_v8, %v470_v31 }
  0xdc   : > { %825 = vrot.lane.b32.xlu0 %v3759_v17, %s3327_s6  ;;  %v777_v36 = vpop.permute.xlu1 %776 }
  0xdd   : > { %v1023_v37 = vsel %vm1019_vm10, %v990_v32, %v777_v36  ;;  %v3848_v22 = vsel %vm3516_vm2, %v566_v19, 0  ;;  %v567_v32 = vrot.slane %v480_v6, 1 }
  0xde   : > { %v810_v29 = vpop.permute.xlu0 %809  ;;  %857 = vrot.lane.b32.xlu1 %v3718_v46, %s3324_s10 }
  0xdf   : > { %v1056_v42 = vsel %vm1052_vm11, %v1023_v37, %v810_v29 }
  0xe0   : > { %633 = vrot.lane.b32.xlu0 %v3698_v35, %s3321_s26  ;;  %v842_v43 = vpop.permute.xlu1 %841  ;;  %v3797_v35 = vsel %vm3516_vm2, %v564_v41, 0 }
  0xe1   : > { %v1090_v44 = vsel %vm1085_vm12, %v1056_v42, %v842_v43  ;;  %v568_v42 = vor.u32 %v567_v32, %v477_v59 }
  0xe2   : > { %v3786_v38 = vpop.permute.xlu0 %617  ;;  %681 = vrot.lane.b32.xlu1 %v3766_v21, %s3322_s24  ;;  %1302 = vmatmul.mubr.bf16.gmra.mxu0 %v1090_v44 }
  0xe3   : > { %2844 = vmatprep.mubr.msk.bf16.mxu0 %vm871_vm6, %v3615_v55  ;;  %v880_v52 = vsel %vm871_vm6, %v3556_v26, %v3786_v38 }
  0xe4   : > { %729 = vrot.lane.b32.xlu0 %v3759_v17, %s3326_s14  ;;  %v666_v57 = vpop.permute.xlu1 %665 }
  0xe5   : > { %v926_v58 = vsel %vm920_vm7, %v880_v52, %v666_v57 }
  0xe6   : > { %v714_v49 = vpop.permute.xlu0 %713  ;;  %761 = vrot.lane.b32.xlu1 %v3718_v46, %s3323_s9 }
  0xe7   : > { %v959_v55 = vsel %vm953_vm8, %v926_v58, %v714_v49  ;;  %v3880_v58 = vld [vmem:[%s3502_s13 + $0x70] sm:$0xff]  }
  0xe8   : > { %794 = vrot.lane.b32.xlu0 %v3797_v35, %s3325_s12  ;;  %v746_v1 = vpop.permute.xlu1 %745  ;;  %v491_v4 = vshrl.u32 %v3880_v58, 16 }
  0xe9   : > { %v992_v26 = vsel %vm986_vm9, %v959_v55, %v746_v1 }
  0xea   : > { %v779_v60 = vpop.permute.xlu0 %778  ;;  %827 = vrot.lane.b32.xlu1 %v3815_v61, %s3327_s6 }
  0xeb   : > { %v1025_v9 = vsel %vm1019_vm10, %v992_v26, %v779_v60 }
  0xec   : > { %859 = vrot.lane.b32.xlu0 %v3769_v23, %s3324_s10  ;;  %v812_v10 = vpop.permute.xlu1 %811 }
  0xed   : > { %v1058_v14 = vsel %vm1052_vm11, %v1025_v9, %v812_v10  ;;  %v493_v9 = vrot.slane %v491_v4, 7  ;;  %v494_v10 = vshll.u32 %v3880_v58, 16 }
  0xee   : > { %v844_v7 = vpop.permute.xlu0 %843  ;;  %635 = vrot.lane.b32.xlu1 %v3718_v46, %s3321_s26  ;;  %v3844_v46 = vsel %vm3535_vm5, 0, %v482_v16 }
  0xef   : > { %v1093_v15 = vsel %vm1085_vm12, %v1058_v14, %v844_v7 }
  0xf0   : > { %683 = vrot.lane.b32.xlu0 %v3797_v35, %s3322_s24  ;;  %1310 = vmatmul.mubr.bf16.gmra.mxu0 %v1093_v15  ;;  %v3831_v24 = vpop.permute.xlu1 %619 }
  0xf1   : > { %2845 = vmatprep.mubr.msk.bf16.mxu0 %vm871_vm6, %v3630_v62  ;;  %v883_v27 = vsel %vm871_vm6, %v3567_v30, %v3831_v24  ;;  %v3851_v62 = vld [vmem:[%s3502_s13 + $0x68] sm:$0xff]  }
  0xf2   : > { %v668_v18 = vpop.permute.xlu0 %667  ;;  %731 = vrot.lane.b32.xlu1 %v3815_v61, %s3326_s14  ;;  %v484_v37 = vshrl.u32 %v3851_v62, 16  ;;  %v487_v49 = vshll.u32 %v3851_v62, 16 }
  0xf3   : > { %v928_v29 = vsel %vm920_vm7, %v883_v27, %v668_v18 }
  0xf4   : > { %763 = vrot.lane.b32.xlu0 %v3769_v23, %s3323_s9  ;;  %v716_v30 = vpop.permute.xlu1 %715  ;;  %v486_v44 = vrot.slane %v484_v37, 7  ;;  %v569_v15 = vrot.slane %v487_v49, 1 }
  0xf5   : > { %v961_v31 = vsel %vm953_vm8, %v928_v29, %v716_v30 }
  0xf6   : > { %v748_v28 = vpop.permute.xlu0 %747  ;;  %796 = vrot.lane.b32.xlu1 %v3848_v22, %s3325_s12  ;;  %v489_v60 = vor.u32 %v487_v49, %v486_v44  ;;  %v570_v30 = vor.u32 %v569_v15, %v484_v37 }
  0xf7   : > { %v994_v41 = vsel %vm986_vm9, %v961_v31, %v748_v28  ;;  %v496_v28 = vor.u32 %v494_v10, %v493_v9 }
  0xf8   : > { %829 = vrot.lane.b32.xlu0 %v3844_v46, %s3327_s6  ;;  %v781_v39 = vpop.permute.xlu1 %780  ;;  %v3895_v7 = vsel %vm3535_vm5, 0, %v489_v60  ;;  %v3928_v37 = vsel %vm3516_vm2, %v570_v30, 0 }
  0xf9   : > { %v1027_v40 = vsel %vm1019_vm10, %v994_v41, %v781_v39 }
  0xfa   : > { %v814_v36 = vpop.permute.xlu0 %813  ;;  %861 = vrot.lane.b32.xlu1 %v3800_v48, %s3324_s10 }
  0xfb   : > { %v1060_v50 = vsel %vm1052_vm11, %v1027_v40, %v814_v36  ;;  %v571_v40 = vrot.slane %v494_v10, 1 }
  0xfc   : > { %637 = vrot.lane.b32.xlu0 %v3769_v23, %s3321_s26  ;;  %v846_v52 = vpop.permute.xlu1 %845  ;;  %v3877_v23 = vsel %vm3516_vm2, %v568_v42, 0 }
  0xfd   : > { %v1096_v57 = vsel %vm1085_vm12, %v1060_v50, %v846_v52 }
  0xfe   : > { %v3866_v43 = vpop.permute.xlu0 %621  ;;  %685 = vrot.lane.b32.xlu1 %v3848_v22, %s3322_s24  ;;  %1318 = vmatmul.mubr.bf16.gmra.mxu0 %v1096_v57  ;;  %v572_v57 = vor.u32 %v571_v40, %v491_v4 }
  0xff   : > { %2846 = vmatprep.mubr.msk.bf16.mxu0 %vm871_vm6, %v3655_v12  ;;  %v886_v55 = vsel %vm871_vm6, %v3594_v47, %v3866_v43 }
 0x100   : > { %733 = vrot.lane.b32.xlu0 %v3844_v46, %s3326_s14  ;;  %v670_v1 = vpop.permute.xlu1 %669 }
 0x101   : > { %v930_v26 = vsel %vm920_vm7, %v886_v55, %v670_v1 }
 0x102   : > { %v718_v59 = vpop.permute.xlu0 %717  ;;  %765 = vrot.lane.b32.xlu1 %v3800_v48, %s3323_s9 }
 0x103   : > { %v963_v12 = vsel %vm953_vm8, %v930_v26, %v718_v59 }
 0x104   : > { %798 = vrot.lane.b32.xlu0 %v3877_v23, %s3325_s12  ;;  %v750_v8 = vpop.permute.xlu1 %749 }
 0x105   : > { %v996_v47 = vsel %vm986_vm9, %v963_v12, %v750_v8 }
 0x106   : > { %v783_v6 = vpop.permute.xlu0 %782  ;;  %831 = vrot.lane.b32.xlu1 %v3895_v7, %s3327_s6 }
 0x107   : > { %v1029_v16 = vsel %vm1019_vm10, %v996_v47, %v783_v6 }
 0x108   : > { %863 = vrot.lane.b32.xlu0 %v3851_v62, %s3324_s10  ;;  %v816_v18 = vpop.permute.xlu1 %815 }
 0x109   : > { %v1062_v19 = vsel %vm1052_vm11, %v1029_v16, %v816_v18 }
 0x10a   : > { %v848_v14 = vpop.permute.xlu0 %847  ;;  %639 = vrot.lane.b32.xlu1 %v3800_v48, %s3321_s26  ;;  %v3924_v48 = vsel %vm3535_vm5, 0, %v496_v28 }
 0x10b   : > { %v1099_v27 = vsel %vm1085_vm12, %v1062_v19, %v848_v14 }
 0x10c   : > { %687 = vrot.lane.b32.xlu0 %v3877_v23, %s3322_s24  ;;  %1326 = vmatmul.mubr.bf16.gmra.mxu0 %v1099_v27  ;;  %v3911_v31 = vpop.permute.xlu1 %623 }
 0x10d   : > { %2847 = vmatprep.mubr.msk.bf16.mxu0 %vm871_vm6, %v3670_v20  ;;  %v889_v32 = vsel %vm871_vm6, %v3611_v54, %v3911_v31  ;;  %v3153_v20 = vld [vmem:[%s3502_s13 + $0x78] sm:$0xff]  }
 0x10e   : > { %v672_v29 = vpop.permute.xlu0 %671  ;;  %735 = vrot.lane.b32.xlu1 %v3895_v7, %s3326_s14  ;;  %v498_v44 = vshrl.u32 %v3153_v20, 16  ;;  %v501_v55 = vshll.u32 %v3153_v20, 16 }
 0x10f   : > { %v932_v41 = vsel %vm920_vm7, %v889_v32, %v672_v29 }
 0x110   : > { %767 = vrot.lane.b32.xlu0 %v3851_v62, %s3323_s9  ;;  %v720_v39 = vpop.permute.xlu1 %719  ;;  %v500_v60 = vrot.slane %v498_v44, 7  ;;  %v573_v18 = vrot.slane %v501_v55, 1 }
 0x111   : > { %v965_v54 = vsel %vm953_vm8, %v932_v41, %v720_v39 }
 0x112   : > { %v752_v36 = vpop.permute.xlu0 %751  ;;  %800 = vrot.lane.b32.xlu1 %v3928_v37, %s3325_s12  ;;  %v503_v12 = vor.u32 %v501_v55, %v500_v60  ;;  %v574_v32 = vor.u32 %v573_v18, %v498_v44 }
 0x113   : > { %v998_v49 = vsel %vm986_vm9, %v965_v54, %v752_v36 }
 0x114   : > { %833 = vrot.lane.b32.xlu0 %v3924_v48, %s3327_s6  ;;  %v785_v50 = vpop.permute.xlu1 %784  ;;  %v540_v14 = vsel %vm3535_vm5, 0, %v503_v12 }
 0x115   : > { %v1031_v52 = vsel %vm1019_vm10, %v998_v49, %v785_v50 }
 0x116   : > { %v818_v42 = vpop.permute.xlu0 %817  ;;  %865 = vrot.lane.b32.xlu1 %v3880_v58, %s3324_s10 }
 0x117   : > { %v1064_v1 = vsel %vm1052_vm11, %v1031_v52, %v818_v42 }
 0x118   : > { %641 = vrot.lane.b32.xlu0 %v3851_v62, %s3321_s26  ;;  %v850_v26 = vpop.permute.xlu1 %849  ;;  %v3953_v62 = vsel %vm3516_vm2, %v572_v57, 0 }
 0x119   : > { %v1102_v6 = vsel %vm1085_vm12, %v1064_v1, %v850_v26 }
 0x11a   : > { %v3943_v59 = vpop.permute.xlu0 %625  ;;  %689 = vrot.lane.b32.xlu1 %v3928_v37, %s3322_s24  ;;  %1334 = vmatmul.mubr.bf16.gmra.mxu0 %v1102_v6 }
 0x11b   : > { %2848 = vmatprep.mubr.msk.bf16.mxu0 %vm871_vm6, %v3695_v34  ;;  %v892_v8 = vsel %vm871_vm6, %v3638_v5, %v3943_v59 }
 0x11c   : > { %737 = vrot.lane.b32.xlu0 %v3924_v48, %s3326_s14  ;;  %v674_v47 = vpop.permute.xlu1 %673 }
 0x11d   : > { %v934_v9 = vsel %vm920_vm7, %v892_v8, %v674_v47 }
 0x11e   : > { %v722_v4 = vpop.permute.xlu0 %721  ;;  %769 = vrot.lane.b32.xlu1 %v3880_v58, %s3323_s9 }
 0x11f   : > { %v967_v15 = vsel %vm953_vm8, %v934_v9, %v722_v4 }
 0x120   : > { %802 = vrot.lane.b32.xlu0 %v3953_v62, %s3325_s12  ;;  %v754_v34 = vpop.permute.xlu1 %753 }
 0x121   : > { %v1000_v16 = vsel %vm986_vm9, %v967_v15, %v754_v34 }
 0x122   : > { %v787_v10 = vpop.permute.xlu0 %786  ;;  %835 = vrot.lane.b32.xlu1 %v540_v14, %s3327_s6 }
 0x123   : > { %v1033_v19 = vsel %vm1019_vm10, %v1000_v16, %v787_v10 }
 0x124   : > { %867 = vrot.lane.b32.xlu0 %v3153_v20, %s3324_s10  ;;  %v820_v27 = vpop.permute.xlu1 %819 }
 0x125   : > { %v1066_v28 = vsel %vm1052_vm11, %v1033_v19, %v820_v27 }
 0x126   : > { %v852_v5 = vpop.permute.xlu0 %851  ;;  %643 = vrot.lane.b32.xlu1 %v3880_v58, %s3321_s26  ;;  %v3989_v58 = vsel %vm3516_vm2, %v574_v32, 0 }
 0x127   : > { %v1105_v29 = vsel %vm1085_vm12, %v1066_v28, %v852_v5 }
 0x128   : > { %691 = vrot.lane.b32.xlu0 %v3953_v62, %s3322_s24  ;;  %1342 = vmatmul.mubr.bf16.gmra.mxu0 %v1105_v29  ;;  %v3978_v36 = vpop.permute.xlu1 %627 }
 0x129   : > { %2849 = vmatprep.mubr.msk.bf16.mxu0 %vm871_vm6, %v3715_v45  ;;  %v895_v41 = vsel %vm871_vm6, %v3651_v11, %v3978_v36 }
 0x12a   : > { %v676_v30 = vpop.permute.xlu0 %675  ;;  %739 = vrot.lane.b32.xlu1 %v540_v14, %s3326_s14 }
 0x12b   : > { %v936_v54 = vsel %vm920_vm7, %v895_v41, %v676_v30 }
 0x12c   : > { %771 = vrot.lane.b32.xlu0 %v3153_v20, %s3323_s9  ;;  %v724_v40 = vpop.permute.xlu1 %723 }
 0x12d   : > { %v969_v42 = vsel %vm953_vm8, %v936_v54, %v724_v40 }
 0x12e   : > { %v756_v39 = vpop.permute.xlu0 %755  ;;  %804 = vrot.lane.b32.xlu1 %v3989_v58, %s3325_s12 }
 0x12f   : > { %v1002_v45 = vsel %vm986_vm9, %v969_v42, %v756_v39 }
 0x130   : > { %837 = vrot.lane.b32.xlu0 %v3724_v51, %s3327_s6  ;;  %v789_v20 = vpop.permute.xlu1 %788 }
 0x131   : > { %v1035_v44 = vsel %vm1019_vm10, %v1002_v45, %v789_v20 }
 0x132   : > { %v822_v11 = vpop.permute.xlu0 %821  ;;  %869 = vrot.lane.b32.xlu1 %v3320_v0, %s3324_s10 }
 0x133   : > { %v1068_v50 = vsel %vm1052_vm11, %v1035_v44, %v822_v11 }
 0x134   : > { %v854_v52 = vpop.permute.xlu1 %853 }
 0x135   : > { %v1108_v57 = vsel %vm1085_vm12, %v1068_v50, %v854_v52 }
 0x136   : > { %v4001_v49 = vpop.permute.xlu0 %629  ;;  %1350 = vmatmul.mubr.bf16.gmra.mxu0 %v1108_v57 }
 0x137   : > { %2850 = vmatprep.mubr.msk.bf16.mxu0 %vm871_vm6, %v3766_v21  ;;  %v898_v60 = vsel %vm871_vm6, %v3678_v25, %v4001_v49 }
 0x138   : > { %v678_v55 = vpop.permute.xlu1 %677 }
 0x139   : > { %v938_v1 = vsel %vm920_vm7, %v898_v60, %v678_v55 }
 0x13a   : > { %v726_v51 = vpop.permute.xlu0 %725 }
 0x13b   : > { %v971_v6 = vsel %vm953_vm8, %v938_v1, %v726_v51 }
 0x13c   : > { %v758_v4 = vpop.permute.xlu1 %757 }
 0x13d   : > { %v1004_v12 = vsel %vm986_vm9, %v971_v6, %v758_v4 }
 0x13e   : > { %v791_v26 = vpop.permute.xlu0 %790 }
 0x13f   : > { %v1037_v47 = vsel %vm1019_vm10, %v1004_v12, %v791_v26 }
 0x140   : > { %v824_v9 = vpop.permute.xlu1 %823 }
 0x141   : > { %v1070_v10 = vsel %vm1052_vm11, %v1037_v47, %v824_v9 }
 0x142   : > { %v856_v8 = vpop.permute.xlu0 %855 }
 0x143   : > { %v1111_v21 = vsel %vm1085_vm12, %v1070_v10, %v856_v8 }
 0x144   : > { %1358 = vmatmul.mubr.bf16.gmra.mxu0 %v1111_v21  ;;  %v4016_v25 = vpop.permute.xlu1 %631 }
 0x145   : > { %2851 = vmatprep.mubr.msk.bf16.mxu0 %vm871_vm6, %v3797_v35  ;;  %v901_v15 = vsel %vm871_vm6, %v3691_v33, %v4016_v25 }
 0x146   : > { %v680_v14 = vpop.permute.xlu0 %679 }
 0x147   : > { %v940_v16 = vsel %vm920_vm7, %v901_v15, %v680_v14 }
 0x148   : > { %v728_v5 = vpop.permute.xlu1 %727 }
 0x149   : > { %v973_v18 = vsel %vm953_vm8, %v940_v16, %v728_v5 }
 0x14a   : > { %v760_v34 = vpop.permute.xlu0 %759 }
 0x14b   : > { %v1006_v27 = vsel %vm986_vm9, %v973_v18, %v760_v34 }
 0x14c   : > { %v793_v28 = vpop.permute.xlu1 %792 }
 0x14d   : > { %v1039_v29 = vsel %vm1019_vm10, %v1006_v27, %v793_v28 }
 0x14e   : > { %v826_v19 = vpop.permute.xlu0 %825 }
 0x14f   : > { %v1072_v35 = vsel %vm1052_vm11, %v1039_v29, %v826_v19 }
 0x150   : > { %v858_v32 = vpop.permute.xlu1 %857 }
 0x151   : > { %v1114_v41 = vsel %vm1085_vm12, %v1072_v35, %v858_v32 }
 0x152   : > { %v4027_v30 = vpop.permute.xlu0 %633  ;;  %1366 = vmatmul.mubr.bf16.gmra.mxu0 %v1114_v41 }
 0x153   : > { %2852 = vmatprep.mubr.msk.bf16.mxu0 %vm871_vm6, %v3848_v22  ;;  %v904_v39 = vsel %vm871_vm6, %v3730_v53, %v4027_v30 }
 0x154   : > { %v682_v54 = vpop.permute.xlu1 %681 }
 0x155   : > { %v942_v40 = vsel %vm920_vm7, %v904_v39, %v682_v54 }
 0x156   : > { %v730_v33 = vpop.permute.xlu0 %729 }
 0x157   : > { %v975_v11 = vsel %vm953_vm8, %v942_v40, %v730_v33  ;;  %v3154_v40 = vld [vmem:[#allocation7 + $0x38] sm:$0xff]  }
 0x158   : > { %v762_v45 = vpop.permute.xlu1 %761  ;;  %2345 = vmatpush1.bf16.msra.mxu1 %v3154_v40 }
 0x159   : > { %v1008_v20 = vsel %vm986_vm9, %v975_v11, %v762_v45  ;;  %2346 = vmatprep.subr.bf16.mxu1 %v3320_v0 }
 0x15a   : > { %v795_v42 = vpop.permute.xlu0 %794 }
 0x15b   : > { %v1041_v50 = vsel %vm1019_vm10, %v1008_v20, %v795_v42 }
 0x15c   : > { %v828_v52 = vpop.permute.xlu1 %827 }
 0x15d   : > { %v1074_v57 = vsel %vm1052_vm11, %v1041_v50, %v828_v52 }
 0x15e   : > { %v860_v44 = vpop.permute.xlu0 %859 }
 0x15f   : > { %v1117_v22 = vsel %vm1085_vm12, %v1074_v57, %v860_v44  ;;  %v3155_v44 = vld [vmem:[#allocation7 + $0x30] sm:$0xff]   ;;  %v3156_v57 = vld [vmem:[#allocation7 + $0x28] sm:$0xff]  }
 0x160   : > { %1374 = vmatmul.mubr.bf16.gmra.mxu0 %v1117_v22  ;;  %v4042_v53 = vpop.permute.xlu1 %635  ;;  %2347 = vmatpush1.bf16.msra.mxu1 %v3155_v44 }
 0x161   : > { %2853 = vmatprep.mubr.msk.bf16.mxu0 %vm871_vm6, %v3877_v23  ;;  %v907_v60 = vsel %vm871_vm6, %v3759_v17, %v4042_v53  ;;  %2348 = vmatprep.subr.bf16.mxu1 %v3320_v0 }
 0x162   : > { %v684_v51 = vpop.permute.xlu0 %683 }
 0x163   : > { %v944_v1 = vsel %vm920_vm7, %v907_v60, %v684_v51 }
 0x164   : > { %v732_v26 = vpop.permute.xlu1 %731  ;;  %2349 = vmatpush1.bf16.msra.mxu1 %v3156_v57 }
 0x165   : > { %v977_v6 = vsel %vm953_vm8, %v944_v1, %v732_v26  ;;  %2350 = vmatprep.subr.bf16.mxu1 %v3320_v0  ;;  %v3157_v1 = vld [vmem:[#allocation7 + $0x20] sm:$0xff]  }
 0x166   : > { %v764_v55 = vpop.permute.xlu0 %763 }
 0x167   : > { %v1010_v12 = vsel %vm986_vm9, %v977_v6, %v764_v55 }
 0x168   : > { %v797_v8 = vpop.permute.xlu1 %796  ;;  %2351 = vmatpush1.bf16.msra.mxu1 %v3157_v1  ;;  %v3163_v1 = vld [vmem:[#allocation7 + $0x40] sm:$0xff]  }
 0x169   : > { %v1043_v47 = vsel %vm1019_vm10, %v1010_v12, %v797_v8  ;;  %2352 = vmatprep.subr.bf16.mxu1 %v3320_v0  ;;  %v3158_v8 = vld [vmem:[#allocation7 + $0x18] sm:$0xff]  }
 0x16a   : > { %v830_v4 = vpop.permute.xlu0 %829 }
 0x16b   : > { %v1076_v23 = vsel %vm1052_vm11, %v1043_v47, %v830_v4 }
 0x16c   : > { %v862_v10 = vpop.permute.xlu1 %861  ;;  %2353 = vmatpush1.bf16.msra.mxu1 %v3158_v8 }
 0x16d   : > { %v1120_v21 = vsel %vm1085_vm12, %v1076_v23, %v862_v10  ;;  %2354 = vmatprep.subr.bf16.mxu1 %v3320_v0  ;;  %v3159_v10 = vld [vmem:[#allocation7 + $0x10] sm:$0xff]  }
 0x16e   : > { %v4053_v9 = vpop.permute.xlu0 %637  ;;  %1382 = vmatmul.mubr.bf16.gmra.mxu0 %v1120_v21 }
 0x16f   : > { %2854 = vmatprep.mubr.msk.bf16.mxu0 %vm871_vm6, %v3928_v37  ;;  %v910_v14 = vsel %vm871_vm6, %v3815_v61, %v4053_v9 }
 0x170   : > { %v686_v15 = vpop.permute.xlu1 %685  ;;  %2355 = vmatpush1.bf16.msra.mxu1 %v3159_v10 }
 0x171   : > { %v946_v34 = vsel %vm920_vm7, %v910_v14, %v686_v15  ;;  %v4102_v14 = vld [vmem:[%s4748_s2] ss:$0 sm:$0xff]  ;;  %2356 = vmatprep.subr.bf16.mxu1 %v3320_v0 }
 0x172   : > { %v734_v17 = vpop.permute.xlu0 %733 }
 0x173   : > { %v979_v5 = vsel %vm953_vm8, %v946_v34, %v734_v17 }
 0x174   : > { %v766_v18 = vpop.permute.xlu1 %765 }
 0x175   : > { %v1012_v19 = vsel %vm986_vm9, %v979_v5, %v766_v18  ;;  %v3160_v5 = vld [vmem:[#allocation7 + $0x8] sm:$0xff]  }
 0x176   : > { %v799_v16 = vpop.permute.xlu0 %798  ;;  %2357 = vmatpush1.bf16.msra.mxu1 %v3160_v5 }
 0x177   : > { %v1045_v28 = vsel %vm1019_vm10, %v1012_v19, %v799_v16  ;;  %2358 = vmatprep.subr.bf16.mxu1 %v3320_v0 }
 0x178   : > { %v832_v29 = vpop.permute.xlu1 %831 }
 0x179   : > { %v1078_v35 = vsel %vm1052_vm11, %v1045_v28, %v832_v29 }
 0x17a   : > { %v864_v27 = vpop.permute.xlu0 %863 }
 0x17b   : > { %v1123_v37 = vsel %vm1085_vm12, %v1078_v35, %v864_v27 }
 0x17c   : > { %1390 = vmatmul.mubr.bf16.gmra.mxu0 %v1123_v37  ;;  %v4068_v61 = vpop.permute.xlu1 %639 }
 0x17d   : > { %2855 = vmatprep.mubr.msk.bf16.mxu0 %vm871_vm6, %v3953_v62  ;;  %v913_v41 = vsel %vm871_vm6, %v3844_v46, %v4068_v61 }
 0x17e   : > { %v688_v32 = vpop.permute.xlu0 %687 }
 0x17f   : > { %v948_v39 = vsel %vm920_vm7, %v913_v41, %v688_v32  ;;  %v3161_v41 = vld [vmem:[#allocation7] sm:$0xff]  }
 0x180   : > { %v736_v54 = vpop.permute.xlu1 %735  ;;  %2359 = vmatpush1.bf16.msra.mxu1 %v3161_v41 }
 0x181   : > { %v981_v42 = vsel %vm953_vm8, %v948_v39, %v736_v54  ;;  %2372 = vmatprep.subr.bf16.mxu1 %v3320_v0 }
 0x182   : > { %v768_v33 = vpop.permute.xlu0 %767 }
 0x183   : > { %v1014_v45 = vsel %vm986_vm9, %v981_v42, %v768_v33 }
 0x184   : > { %v801_v20 = vpop.permute.xlu1 %800 }
 0x185   : > { %v1047_v62 = vsel %vm1019_vm10, %v1014_v45, %v801_v20  ;;  %v3162_v45 = vld [vmem:[#allocation7 + $0x48] sm:$0xff]  }
 0x186   : > { %v834_v11 = vpop.permute.xlu0 %833  ;;  %2373 = vmatpush2.bf16.msra.mxu1 %v3162_v45 }
 0x187   : > { %v1080_v46 = vsel %vm1052_vm11, %v1047_v62, %v834_v11  ;;  %2374 = vmatprep.subr.bf16.mxu1 %v3320_v0 }
 0x188   : > { %v866_v52 = vpop.permute.xlu1 %865 }
 0x189   : > { %v1126_v22 = vsel %vm1085_vm12, %v1080_v46, %v866_v52 }
 0x18a   : > { %v4080_v50 = vpop.permute.xlu0 %641  ;;  %1398 = vmatmul.mubr.bf16.gmra.mxu0 %v1126_v22  ;;  %2375 = vmatpush2.bf16.msra.mxu1 %v3163_v1 }
 0x18b   : > { %2856 = vmatprep.mubr.msk.bf16.mxu0 %vm871_vm6, %v3989_v58  ;;  %v916_v60 = vsel %vm871_vm6, %v3895_v7, %v4080_v50 }
 0x18c   : > { %v690_v55 = vpop.permute.xlu1 %689 }
 0x18d   : > { %v950_v26 = vsel %vm920_vm7, %v916_v60, %v690_v55 }
 0x18e   : > { %v738_v51 = vpop.permute.xlu0 %737 }
 0x18f   : > { %v983_v4 = vsel %vm953_vm8, %v950_v26, %v738_v51 }
 0x190   : > { %v770_v12 = vpop.permute.xlu1 %769 }
 0x191   : > { %v1016_v58 = vsel %vm986_vm9, %v983_v4, %v770_v12 }
 0x192   : > { %v803_v6 = vpop.permute.xlu0 %802 }
 0x193   : > { %v1049_v7 = vsel %vm1019_vm10, %v1016_v58, %v803_v6 }
 0x194   : > { %v836_v23 = vpop.permute.xlu1 %835 }
 0x195   : > { %v1082_v21 = vsel %vm1052_vm11, %v1049_v7, %v836_v23 }
 0x196   : > { %v868_v47 = vpop.permute.xlu0 %867 }
 0x197   : > { %v1129_v17 = vsel %vm1085_vm12, %v1082_v21, %v868_v47  ;;  %v1295_v15 = vpop.f32.mrf.mxu0 }
 0x198   : > { %1406 = vmatmul.mubr.bf16.gmra.mxu0 %v1129_v17  ;;  %v4105_v16 = vpop.permute.xlu1 %643  ;;  %v1296_v27 = vadd.f32 %v4102_v14, %v1295_v15 }
 0x199   : > { %2857 = vmatprep.mubr.msk.bf16.mxu0 %vm871_vm6, %v3523_v3  ;;  %v919_v18 = vsel %vm871_vm6, %v3924_v48, %v4105_v16  ;;  %v1297_v19 = vpop.f32.mrf.mxu0 }
 0x19a   : > { %v692_v34 = vpop.permute.xlu0 %691  ;;  %v1422_v54 = vmax.f32 %v1296_v27, 0.0 }
 0x19b   : > { %v1298_v28 = vpop.f32.mrf.mxu0  ;;  %v952_v35 = vsel %vm920_vm7, %v919_v18, %v692_v34 }
 0x19c   : > { %v1299_v37 = vadd.f32 %v4102_v14, %v1298_v28  ;;  %v740_v32 = vpop.permute.xlu1 %739 }
 0x19d   : > { %v985_v33 = vsel %vm953_vm8, %v952_v35, %v740_v32  ;;  %v1300_v39 = vpop.f32.mrf.mxu0 }
 0x19e   : > { %v772_v29 = vpop.permute.xlu0 %771  ;;  %v1423_v40 = vmax.f32 %v1299_v37, 0.0 }
 0x19f   : > { %v1018_v42 = vsel %vm986_vm9, %v985_v33, %v772_v29 }
 0x1a0   : > { %v1454_v48 = vpack.c.bf16 %v1423_v40, %v1422_v54  ;;  %v805_v11 = vpop.permute.xlu1 %804 }
 0x1a1   : > { %v1051_v20 = vsel %vm1019_vm10, %v1018_v42, %v805_v11 }
 0x1a2   : > { %v4120_v44 = vpop.permute.xlu0 %837  ;;  %1817 = vrot.lane.b32.xlu1 %v1454_v48, %s3323_s9  ;;  %v1303_v62 = vpop.f32.mrf.mxu0  ;;  %v1471_v46 = vshrl.u32 %v1454_v48, 16  ;;  %v1474_v52 = vshll.u32 %v1454_v48, 16 }
 0x1a3   : > { %v1084_v57 = vsel %vm1052_vm11, %v1051_v20, %v4120_v44  ;;  %v1304_v26 = vadd.f32 %v4102_v14, %v1303_v62 }
 0x1a4   : > { %v4126_v22 = vpop.permute.xlu1 %869  ;;  %v1305_v51 = vpop.f32.mrf.mxu0  ;;  %v1473_v60 = vrot.slane %v1471_v46, 7  ;;  %v1614_v55 = vrot.slane %v1474_v52, 1 }
 0x1a5   : > { %v1132_v6 = vsel %vm1085_vm12, %v1084_v57, %v4126_v22  ;;  %v1424_v7 = vmax.f32 %v1304_v26, 0.0 }
 0x1a6   : > { %1693 = vrot.lane.b32.xlu1 %v1454_v48, %s3321_s26  ;;  %v1306_v4 = vpop.f32.mrf.mxu0  ;;  %1414 = vmatmul.mubr.bf16.gmra.mxu0 %v1132_v6  ;;  %v1476_v12 = vor.u32 %v1474_v52, %v1473_v60  ;;  %v1615_v47 = vor.u32 %v1614_v55, %v1471_v46 }
 0x1a7   : > { %v1307_v0 = vadd.f32 %v4102_v14, %v1306_v4 }
 0x1a8   : > { %v1308_v8 = vpop.f32.mrf.mxu0  ;;  %v4135_v58 = vsel %vm3535_vm5, 0, %v1476_v12  ;;  %v1662_v21 = vsel %vm3516_vm2, %v1615_v47, 0 }
 0x1a9   : > { %v1425_v23 = vmax.f32 %v1307_v0, 0.0  ;;  %1784 = vrot.lane.b32.xlu0 %v4135_v58, %s3326_s14 }
 0x1ab   : > { %v1455_v10 = vpack.c.bf16 %v1425_v23, %v1424_v7 }
 0x1ad   : > { %1850 = vrot.lane.b32.xlu0 %v1662_v21, %s3325_s12  ;;  %v1478_v17 = vshrl.u32 %v1455_v10, 16  ;;  %v1481_v15 = vshll.u32 %v1455_v10, 16 }
 0x1af   : > { %v1480_v5 = vrot.slane %v1478_v17, 7  ;;  %v1616_v18 = vrot.slane %v1481_v15, 1 }
 0x1b0   : > { %v1311_v34 = vpop.f32.mrf.mxu0 }
 0x1b1   : > { %1738 = vrot.lane.b32.xlu0 %v1662_v21, %s3322_s24  ;;  %v1483_v27 = vor.u32 %v1481_v15, %v1480_v5  ;;  %v1617_v28 = vor.u32 %v1616_v18, %v1478_v17  ;;  %v1312_v29 = vadd.f32 %v4102_v14, %v1311_v34 }
 0x1b2   : > { %v1313_v19 = vpop.f32.mrf.mxu0 }
 0x1b3   : > { %v4146_v37 = vsel %vm3535_vm5, 0, %v1483_v27  ;;  %v1663_v32 = vsel %vm3516_vm2, %v1617_v28, 0  ;;  %v1426_v54 = vmax.f32 %v1312_v29, 0.0 }
 0x1b4   : > { %v1314_v35 = vpop.f32.mrf.mxu0  ;;  %1882 = vrot.lane.b32.xlu1 %v4146_v37, %s3327_s6  ;;  %v2194_v33 = vsel %vm871_vm6, %v1663_v32, %v3732_v56 }
 0x1b5   : > { %v1315_v41 = vadd.f32 %v4102_v14, %v1314_v35  ;;  %1912 = vrot.lane.b32.xlu0 %v1455_v10, %s3324_s10  ;;  %2869 = vmatprep.mubr.msk.bf16.mxu1 %vm920_vm7, %v2194_v33 }
 0x1b6   : > { %v1316_v39 = vpop.f32.mrf.mxu0 }
 0x1b7   : > { %v1427_v40 = vmax.f32 %v1315_v41, 0.0 }
 0x1b8   : > { %1786 = vrot.lane.b32.xlu1 %v4146_v37, %s3326_s14 }
 0x1b9   : > { %v1456_v48 = vpack.c.bf16 %v1427_v40, %v1426_v54  ;;  %1819 = vrot.lane.b32.xlu0 %v1455_v10, %s3323_s9 }
 0x1bb   : > { %v1485_v42 = vshrl.u32 %v1456_v48, 16  ;;  %v1488_v45 = vshll.u32 %v1456_v48, 16 }
 0x1bc   : > { %1852 = vrot.lane.b32.xlu1 %v1663_v32, %s3325_s12 }
 0x1bd   : > { %v1487_v11 = vrot.slane %v1485_v42, 7  ;;  %1695 = vrot.lane.b32.xlu0 %v1455_v10, %s3321_s26  ;;  %v1618_v52 = vrot.slane %v1488_v45, 1 }
 0x1be   : > { %v1319_v56 = vpop.f32.mrf.mxu0 }
 0x1bf   : > { %v1490_v20 = vor.u32 %v1488_v45, %v1487_v11  ;;  %v1320_v57 = vadd.f32 %v4102_v14, %v1319_v56  ;;  %v1619_v1 = vor.u32 %v1618_v52, %v1485_v42 }
 0x1c0   : > { %v1321_v62 = vpop.f32.mrf.mxu0  ;;  %1740 = vrot.lane.b32.xlu1 %v1663_v32, %s3322_s24 }
 0x1c1   : > { %v4165_v46 = vsel %vm3535_vm5, 0, %v1490_v20  ;;  %v1428_v26 = vmax.f32 %v1320_v57, 0.0  ;;  %v4177_v12 = vsel %vm3516_vm2, %v1619_v1, 0 }
 0x1c2   : > { %1884 = vrot.lane.b32.xlu0 %v4165_v46, %s3327_s6  ;;  %v1322_v51 = vpop.f32.mrf.mxu0 }
 0x1c3   : > { %v1323_v60 = vadd.f32 %v4102_v14, %v1322_v51 }
 0x1c4   : > { %v1324_v55 = vpop.f32.mrf.mxu0  ;;  %1914 = vrot.lane.b32.xlu1 %v1456_v48, %s3324_s10 }
 0x1c5   : > { %v1429_v6 = vmax.f32 %v1323_v60, 0.0 }
 0x1c6   : > { %1788 = vrot.lane.b32.xlu0 %v4165_v46, %s3326_s14 }
 0x1c7   : > { %v1457_v4 = vpack.c.bf16 %v1429_v6, %v1428_v26 }
 0x1c8   : > { %1821 = vrot.lane.b32.xlu1 %v1456_v48, %s3323_s9 }
 0x1c9   : > { %v1492_v0 = vshrl.u32 %v1457_v4, 16  ;;  %v1495_v7 = vshll.u32 %v1457_v4, 16 }
 0x1ca   : > { %1854 = vrot.lane.b32.xlu0 %v4177_v12, %s3325_s12 }
 0x1cb   : > { %v1494_v47 = vrot.slane %v1492_v0, 7  ;;  %v1620_v34 = vrot.slane %v1495_v7, 1 }
 0x1cc   : > { %v1327_v8 = vpop.f32.mrf.mxu0  ;;  %1697 = vrot.lane.b32.xlu1 %v1456_v48, %s3321_s26 }
 0x1cd   : > { %v1497_v10 = vor.u32 %v1495_v7, %v1494_v47  ;;  %v1328_v21 = vadd.f32 %v4102_v14, %v1327_v8  ;;  %v1621_v28 = vor.u32 %v1620_v34, %v1492_v0 }
 0x1ce   : > { %v1329_v23 = vpop.f32.mrf.mxu0  ;;  %1742 = vrot.lane.b32.xlu0 %v4177_v12, %s3322_s24 }
 0x1cf   : > { %v4187_v15 = vsel %vm3535_vm5, 0, %v1497_v10  ;;  %v1430_v19 = vmax.f32 %v1328_v21, 0.0  ;;  %v4198_v32 = vsel %vm3516_vm2, %v1621_v28, 0 }
 0x1d0   : > { %v1330_v17 = vpop.f32.mrf.mxu0  ;;  %1886 = vrot.lane.b32.xlu1 %v4187_v15, %s3327_s6 }
 0x1d1   : > { %v1331_v5 = vadd.f32 %v4102_v14, %v1330_v17 }
 0x1d2   : > { %v1332_v18 = vpop.f32.mrf.mxu0  ;;  %1916 = vrot.lane.b32.xlu0 %v1457_v4, %s3324_s10 }
 0x1d3   : > { %v1431_v27 = vmax.f32 %v1331_v5, 0.0 }
 0x1d4   : > { %1790 = vrot.lane.b32.xlu1 %v4187_v15, %s3326_s14 }
 0x1d5   : > { %v1458_v29 = vpack.c.bf16 %v1431_v27, %v1430_v19 }
 0x1d6   : > { %1823 = vrot.lane.b32.xlu0 %v1457_v4, %s3323_s9 }
 0x1d7   : > { %v1499_v35 = vshrl.u32 %v1458_v29, 16  ;;  %v1502_v33 = vshll.u32 %v1458_v29, 16 }
 0x1d8   : > { %1856 = vrot.lane.b32.xlu1 %v4198_v32, %s3325_s12 }
 0x1d9   : > { %v1501_v41 = vrot.slane %v1499_v35, 7  ;;  %v1622_v42 = vrot.slane %v1502_v33, 1 }
 0x1da   : > { %1699 = vrot.lane.b32.xlu0 %v1457_v4, %s3321_s26  ;;  %v1335_v39 = vpop.f32.mrf.mxu0 }
 0x1db   : > { %v1504_v54 = vor.u32 %v1502_v33, %v1501_v41  ;;  %v1336_v11 = vadd.f32 %v4102_v14, %v1335_v39  ;;  %v1623_v62 = vor.u32 %v1622_v42, %v1499_v35 }
 0x1dc   : > { %v1337_v40 = vpop.f32.mrf.mxu0  ;;  %1744 = vrot.lane.b32.xlu1 %v4198_v32, %s3322_s24 }
 0x1dd   : > { %v4207_v48 = vsel %vm3535_vm5, 0, %v1504_v54  ;;  %v1432_v52 = vmax.f32 %v1336_v11, 0.0  ;;  %v4219_v60 = vsel %vm3516_vm2, %v1623_v62, 0 }
 0x1de   : > { %1888 = vrot.lane.b32.xlu0 %v4207_v48, %s3327_s6  ;;  %v1338_v45 = vpop.f32.mrf.mxu0 }
 0x1df   : > { %v1339_v56 = vadd.f32 %v4102_v14, %v1338_v45 }
 0x1e0   : > { %v1340_v20 = vpop.f32.mrf.mxu0  ;;  %1918 = vrot.lane.b32.xlu1 %v1458_v29, %s3324_s10 }
 0x1e1   : > { %v1433_v57 = vmax.f32 %v1339_v56, 0.0 }
 0x1e2   : > { %1792 = vrot.lane.b32.xlu0 %v4207_v48, %s3326_s14 }
 0x1e3   : > { %v1459_v51 = vpack.c.bf16 %v1433_v57, %v1432_v52 }
 0x1e4   : > { %1825 = vrot.lane.b32.xlu1 %v1458_v29, %s3323_s9 }
 0x1e5   : > { %v1506_v55 = vshrl.u32 %v1459_v51, 16  ;;  %v1509_v6 = vshll.u32 %v1459_v51, 16 }
 0x1e6   : > { %1858 = vrot.lane.b32.xlu0 %v4219_v60, %s3325_s12 }
 0x1e7   : > { %v1508_v26 = vrot.slane %v1506_v55, 7  ;;  %v1624_v23 = vrot.slane %v1509_v6, 1 }
 0x1e8   : > { %v1343_v1 = vpop.f32.mrf.mxu0  ;;  %1701 = vrot.lane.b32.xlu1 %v1458_v29, %s3321_s26 }
 0x1e9   : > { %v1511_v0 = vor.u32 %v1509_v6, %v1508_v26  ;;  %v1344_v8 = vadd.f32 %v4102_v14, %v1343_v1  ;;  %v1625_v5 = vor.u32 %v1624_v23, %v1506_v55 }
 0x1ea   : > { %v1345_v4 = vpop.f32.mrf.mxu0  ;;  %1746 = vrot.lane.b32.xlu0 %v4219_v60, %s3322_s24 }
 0x1eb   : > { %v4229_v7 = vsel %vm3535_vm5, 0, %v1511_v0  ;;  %v1434_v17 = vmax.f32 %v1344_v8, 0.0  ;;  %v4240_v27 = vsel %vm3516_vm2, %v1625_v5, 0 }
 0x1ec   : > { %v1346_v47 = vpop.f32.mrf.mxu0  ;;  %1890 = vrot.lane.b32.xlu1 %v4229_v7, %s3327_s6 }
 0x1ed   : > { %v1347_v10 = vadd.f32 %v4102_v14, %v1346_v47 }
 0x1ee   : > { %v1348_v21 = vpop.f32.mrf.mxu0  ;;  %1920 = vrot.lane.b32.xlu0 %v1459_v51, %s3324_s10 }
 0x1ef   : > { %v1435_v34 = vmax.f32 %v1347_v10, 0.0 }
 0x1f0   : > { %1794 = vrot.lane.b32.xlu1 %v4229_v7, %s3326_s14 }
 0x1f1   : > { %v1460_v18 = vpack.c.bf16 %v1435_v34, %v1434_v17 }
 0x1f2   : > { %1827 = vrot.lane.b32.xlu0 %v1459_v51, %s3323_s9 }
 0x1f3   : > { %v1513_v19 = vshrl.u32 %v1460_v18, 16  ;;  %v1516_v29 = vshll.u32 %v1460_v18, 16 }
 0x1f4   : > { %1860 = vrot.lane.b32.xlu1 %v4240_v27, %s3325_s12 }
 0x1f5   : > { %v1515_v28 = vrot.slane %v1513_v19, 7  ;;  %v1626_v54 = vrot.slane %v1516_v29, 1 }
 0x1f6   : > { %1703 = vrot.lane.b32.xlu0 %v1459_v51, %s3321_s26  ;;  %v1351_v35 = vpop.f32.mrf.mxu0 }
 0x1f7   : > { %v1518_v41 = vor.u32 %v1516_v29, %v1515_v28  ;;  %v1352_v40 = vadd.f32 %v4102_v14, %v1351_v35  ;;  %v1627_v56 = vor.u32 %v1626_v54, %v1513_v19 }
 0x1f8   : > { %v1353_v33 = vpop.f32.mrf.mxu0  ;;  %1748 = vrot.lane.b32.xlu1 %v4240_v27, %s3322_s24 }
 0x1f9   : > { %v4249_v39 = vsel %vm3535_vm5, 0, %v1518_v41  ;;  %v1436_v20 = vmax.f32 %v1352_v40, 0.0  ;;  %v4261_v57 = vsel %vm3516_vm2, %v1627_v56, 0 }
 0x1fa   : > { %1892 = vrot.lane.b32.xlu0 %v4249_v39, %s3327_s6  ;;  %v1354_v42 = vpop.f32.mrf.mxu0 }
 0x1fb   : > { %v1355_v11 = vadd.f32 %v4102_v14, %v1354_v42 }
 0x1fc   : > { %v1356_v45 = vpop.f32.mrf.mxu0  ;;  %1922 = vrot.lane.b32.xlu1 %v1460_v18, %s3324_s10 }
 0x1fd   : > { %v1437_v62 = vmax.f32 %v1355_v11, 0.0 }
 0x1fe   : > { %1796 = vrot.lane.b32.xlu0 %v4249_v39, %s3326_s14 }
 0x1ff   : > { %v1461_v52 = vpack.c.bf16 %v1437_v62, %v1436_v20 }
 0x200   : > { %1829 = vrot.lane.b32.xlu1 %v1460_v18, %s3323_s9 }
 0x201   : > { %v1520_v51 = vshrl.u32 %v1461_v52, 16  ;;  %v1523_v26 = vshll.u32 %v1461_v52, 16 }
 0x202   : > { %1862 = vrot.lane.b32.xlu0 %v4261_v57, %s3325_s12 }
 0x203   : > { %v1522_v1 = vrot.slane %v1520_v51, 7  ;;  %v1628_v23 = vrot.slane %v1523_v26, 1 }
 0x204   : > { %v1359_v55 = vpop.f32.mrf.mxu0  ;;  %1705 = vrot.lane.b32.xlu1 %v1460_v18, %s3321_s26 }
 0x205   : > { %v1525_v4 = vor.u32 %v1523_v26, %v1522_v1  ;;  %v1360_v0 = vadd.f32 %v4102_v14, %v1359_v55  ;;  %v1629_v5 = vor.u32 %v1628_v23, %v1520_v51 }
 0x206   : > { %v1361_v6 = vpop.f32.mrf.mxu0  ;;  %1750 = vrot.lane.b32.xlu0 %v4261_v57, %s3322_s24 }
 0x207   : > { %v4271_v47 = vsel %vm3535_vm5, 0, %v1525_v4  ;;  %v1438_v17 = vmax.f32 %v1360_v0, 0.0  ;;  %v4282_v28 = vsel %vm3516_vm2, %v1629_v5, 0 }
 0x208   : > { %v1362_v8 = vpop.f32.mrf.mxu0  ;;  %1894 = vrot.lane.b32.xlu1 %v4271_v47, %s3327_s6 }
 0x209   : > { %v1363_v10 = vadd.f32 %v4102_v14, %v1362_v8 }
 0x20a   : > { %v1364_v21 = vpop.f32.mrf.mxu0  ;;  %1924 = vrot.lane.b32.xlu0 %v1461_v52, %s3324_s10 }
 0x20b   : > { %v1439_v34 = vmax.f32 %v1363_v10, 0.0 }
 0x20c   : > { %1798 = vrot.lane.b32.xlu1 %v4271_v47, %s3326_s14 }
 0x20d   : > { %v1462_v18 = vpack.c.bf16 %v1439_v34, %v1438_v17 }
 0x20e   : > { %1831 = vrot.lane.b32.xlu0 %v1461_v52, %s3323_s9 }
 0x20f   : > { %v1527_v19 = vshrl.u32 %v1462_v18, 16  ;;  %v1530_v35 = vshll.u32 %v1462_v18, 16 }
 0x210   : > { %1864 = vrot.lane.b32.xlu1 %v4282_v28, %s3325_s12 }
 0x211   : > { %v1529_v29 = vrot.slane %v1527_v19, 7  ;;  %v1630_v42 = vrot.slane %v1530_v35, 1 }
 0x212   : > { %1707 = vrot.lane.b32.xlu0 %v1461_v52, %s3321_s26  ;;  %v1367_v41 = vpop.f32.mrf.mxu0 }
 0x213   : > { %v1532_v33 = vor.u32 %v1530_v35, %v1529_v29  ;;  %v1368_v11 = vadd.f32 %v4102_v14, %v1367_v41  ;;  %v1631_v62 = vor.u32 %v1630_v42, %v1527_v19 }
 0x214   : > { %v1369_v54 = vpop.f32.mrf.mxu0  ;;  %1752 = vrot.lane.b32.xlu1 %v4282_v28, %s3322_s24  ;;  %v1818_v26 = vpop.permute.xlu1 %1817 }
 0x215   : > { %v4291_v40 = vsel %vm3535_vm5, 0, %v1532_v33  ;;  %v1440_v52 = vmax.f32 %v1368_v11, 0.0  ;;  %v4303_v6 = vsel %vm3516_vm2, %v1631_v62, 0 }
 0x216   : > { %1896 = vrot.lane.b32.xlu0 %v4291_v40, %s3327_s6  ;;  %v1370_v45 = vpop.f32.mrf.mxu0  ;;  %v2208_v13 = vsel %vm871_vm6, %v4303_v6, %v4001_v49 }
 0x217   : > { %v1371_v56 = vadd.f32 %v4102_v14, %v1370_v45 }
 0x218   : > { %v1372_v20 = vpop.f32.mrf.mxu0  ;;  %1926 = vrot.lane.b32.xlu1 %v1462_v18, %s3324_s10  ;;  %v1694_v34 = vpop.permute.xlu1 %1693 }
 0x219   : > { %v1441_v51 = vmax.f32 %v1371_v56, 0.0 }
 0x21a   : > { %1800 = vrot.lane.b32.xlu0 %v4291_v40, %s3326_s14 }
 0x21b   : > { %v1463_v55 = vpack.c.bf16 %v1441_v51, %v1440_v52  ;;  %v1785_v1 = vpop.permute.xlu0 %1784 }
 0x21c   : > { %1833 = vrot.lane.b32.xlu1 %v1462_v18, %s3323_s9  ;;  %v2020_v5 = vsel %vm953_vm8, %v3742_v63, %v1785_v1 }
 0x21d   : > { %v1534_v4 = vshrl.u32 %v1463_v55, 16  ;;  %v1537_v10 = vshll.u32 %v1463_v55, 16  ;;  %v2052_v54 = vsel %vm986_vm9, %v2020_v5, %v1818_v26  ;;  %v2196_v26 = vsel %vm871_vm6, %v4177_v12, %v3786_v38 }
 0x21e   : > { %1866 = vrot.lane.b32.xlu0 %v4303_v6, %s3325_s12  ;;  %v1946_v38 = vsel %vm871_vm6, %v4135_v58, %v1694_v34 }
 0x21f   : > { %v1851_v0 = vpop.permute.xlu0 %1850  ;;  %v1536_v23 = vrot.slane %v1534_v4, 7  ;;  %v1632_v33 = vrot.slane %v1537_v10, 1 }
 0x220   : > { %v1375_v8 = vpop.f32.mrf.mxu0  ;;  %1709 = vrot.lane.b32.xlu1 %v1462_v18, %s3321_s26  ;;  %v2084_v63 = vsel %vm1019_vm10, %v2052_v54, %v1851_v0 }
 0x221   : > { %v1539_v17 = vor.u32 %v1537_v10, %v1536_v23  ;;  %v1376_v19 = vadd.f32 %v4102_v14, %v1375_v8  ;;  %v1633_v52 = vor.u32 %v1632_v33, %v1534_v4 }
 0x222   : > { %v1377_v21 = vpop.f32.mrf.mxu0  ;;  %1754 = vrot.lane.b32.xlu0 %v4303_v6, %s3322_s24 }
 0x223   : > { %v1739_v29 = vpop.permute.xlu0 %1738  ;;  %v4315_v41 = vsel %vm3535_vm5, 0, %v1539_v17  ;;  %v1442_v11 = vmax.f32 %v1376_v19, 0.0  ;;  %v4334_v4 = vsel %vm3516_vm2, %v1633_v52, 0 }
 0x224   : > { %v1378_v35 = vpop.f32.mrf.mxu0  ;;  %1898 = vrot.lane.b32.xlu1 %v4315_v41, %s3327_s6 }
 0x225   : > { %v1379_v18 = vadd.f32 %v4102_v14, %v1378_v35  ;;  %v1990_v35 = vsel %vm920_vm7, %v1946_v38, %v1739_v29 }
 0x226   : > { %v1380_v42 = vpop.f32.mrf.mxu0  ;;  %1928 = vrot.lane.b32.xlu0 %v1463_v55, %s3324_s10  ;;  %v1883_v56 = vpop.permute.xlu1 %1882 }
 0x227   : > { %v1443_v45 = vmax.f32 %v1379_v18, 0.0  ;;  %v2116_v20 = vsel %vm1052_vm11, %v2084_v63, %v1883_v56  ;;  %v1913_v62 = vpop.permute.xlu0 %1912 }
 0x228   : > { %1802 = vrot.lane.b32.xlu1 %v4315_v41, %s3326_s14  ;;  %v2147_v1 = vsel %vm1085_vm12, %v2116_v20, %v1913_v62 }
 0x229   : > { %v1464_v51 = vpack.c.bf16 %v1443_v45, %v1442_v11  ;;  %2377 = vmatmul.mubr.bf16.vlgmr.msra.gmra.mxu1 %v2147_v1 }
 0x22a   : > { %1835 = vrot.lane.b32.xlu0 %v1463_v55, %s3323_s9  ;;  %2870 = vmatprep.mubr.msk.bf16.mxu1 %vm920_vm7, %v2196_v26  ;;  %v1787_v0 = vpop.permute.xlu1 %1786 }
 0x22b   : > { %v1541_v8 = vshrl.u32 %v1464_v51, 16  ;;  %v1820_v23 = vpop.permute.xlu0 %1819  ;;  %v1544_v21 = vshll.u32 %v1464_v51, 16 }
 0x22c   : > { %1868 = vrot.lane.b32.xlu1 %v4334_v4, %s3325_s12 }
 0x22d   : > { %v1543_v10 = vrot.slane %v1541_v8, 7  ;;  %v1634_v54 = vrot.slane %v1544_v21, 1 }
 0x22e   : > { %1711 = vrot.lane.b32.xlu0 %v1463_v55, %s3321_s26  ;;  %v1383_v17 = vpop.f32.mrf.mxu0  ;;  %v1853_v5 = vpop.permute.xlu1 %1852  ;;  %v2022_v55 = vsel %vm953_vm8, %v1990_v35, %v1787_v0 }
 0x22f   : > { %v1546_v19 = vor.u32 %v1544_v21, %v1543_v10  ;;  %v1696_v12 = vpop.permute.xlu0 %1695  ;;  %v1384_v42 = vadd.f32 %v4102_v14, %v1383_v17  ;;  %v2054_v11 = vsel %vm986_vm9, %v2022_v55, %v1820_v23  ;;  %v1635_v56 = vor.u32 %v1634_v54, %v1541_v8 }
 0x230   : > { %v1385_v33 = vpop.f32.mrf.mxu0  ;;  %1756 = vrot.lane.b32.xlu1 %v4334_v4, %s3322_s24  ;;  %v2086_v62 = vsel %vm1019_vm10, %v2054_v11, %v1853_v5  ;;  %v2198_v23 = vsel %vm871_vm6, %v4198_v32, %v3831_v24  ;;  %v1949_v54 = vsel %vm871_vm6, %v4146_v37, %v1696_v12 }
 0x231   : > { %v4346_v18 = vsel %vm3535_vm5, 0, %v1546_v19  ;;  %v1444_v20 = vmax.f32 %v1384_v42, 0.0  ;;  %v4363_v8 = vsel %vm3516_vm2, %v1635_v56, 0 }
 0x232   : > { %1900 = vrot.lane.b32.xlu0 %v4346_v18, %s3327_s6  ;;  %v1386_v58 = vpop.f32.mrf.mxu0  ;;  %v1741_v34 = vpop.permute.xlu1 %1740 }
 0x233   : > { %v1387_v29 = vadd.f32 %v4102_v14, %v1386_v58  ;;  %v1992_v55 = vsel %vm920_vm7, %v1949_v54, %v1741_v34 }
 0x234   : > { %v1885_v63 = vpop.permute.xlu0 %1884  ;;  %v1388_v45 = vpop.f32.mrf.mxu0  ;;  %1930 = vrot.lane.b32.xlu1 %v1464_v51, %s3324_s10 }
 0x235   : > { %v1445_v52 = vmax.f32 %v1387_v29, 0.0  ;;  %v2118_v1 = vsel %vm1052_vm11, %v2086_v62, %v1885_v63 }
 0x236   : > { %1804 = vrot.lane.b32.xlu0 %v4346_v18, %s3326_s14  ;;  %v1915_v26 = vpop.permute.xlu1 %1914 }
 0x237   : > { %v1465_v0 = vpack.c.bf16 %v1445_v52, %v1444_v20  ;;  %v2150_v21 = vsel %vm1085_vm12, %v2118_v1, %v1915_v26 }
 0x238   : > { %v1789_v10 = vpop.permute.xlu0 %1788  ;;  %1837 = vrot.lane.b32.xlu1 %v1464_v51, %s3323_s9  ;;  %2385 = vmatmul.mubr.bf16.gmra.mxu1 %v2150_v21 }
 0x239   : > { %2871 = vmatprep.mubr.msk.bf16.mxu1 %vm920_vm7, %v2198_v23  ;;  %v1548_v17 = vshrl.u32 %v1465_v0, 16  ;;  %v1551_v33 = vshll.u32 %v1465_v0, 16  ;;  %v2024_v32 = vsel %vm953_vm8, %v1992_v55, %v1789_v10 }
 0x23a   : > { %1870 = vrot.lane.b32.xlu0 %v4363_v8, %s3325_s12  ;;  %v1822_v5 = vpop.permute.xlu1 %1821 }
 0x23b   : > { %v1550_v35 = vrot.slane %v1548_v17, 7  ;;  %v2056_v63 = vsel %vm986_vm9, %v2024_v32, %v1822_v5  ;;  %v2200_v5 = vsel %vm871_vm6, %v4219_v60, %v3866_v43 }
 0x23c   : > { %v1391_v19 = vpop.f32.mrf.mxu0  ;;  %v1855_v38 = vpop.permute.xlu0 %1854  ;;  %1713 = vrot.lane.b32.xlu1 %v1464_v51, %s3321_s26  ;;  %v1636_v51 = vrot.slane %v1551_v33, 1 }
 0x23d   : > { %v1553_v24 = vor.u32 %v1551_v33, %v1550_v35  ;;  %v1392_v58 = vadd.f32 %v4102_v14, %v1391_v19  ;;  %v2088_v20 = vsel %vm1019_vm10, %v2056_v63, %v1855_v38 }
 0x23e   : > { %v1393_v42 = vpop.f32.mrf.mxu0  ;;  %1758 = vrot.lane.b32.xlu0 %v4363_v8, %s3322_s24  ;;  %v1698_v29 = vpop.permute.xlu1 %1697  ;;  %v1637_v10 = vor.u32 %v1636_v51, %v1548_v17 }
 0x23f   : > { %v4382_v37 = vsel %vm3535_vm5, 0, %v1553_v24  ;;  %v1446_v56 = vmax.f32 %v1392_v58, 0.0  ;;  %v1952_v55 = vsel %vm871_vm6, %v4165_v46, %v1698_v29 }
 0x240   : > { %v1394_v11 = vpop.f32.mrf.mxu0  ;;  %v1743_v45 = vpop.permute.xlu0 %1742  ;;  %1902 = vrot.lane.b32.xlu1 %v4382_v37, %s3327_s6  ;;  %v4400_v17 = vsel %vm3516_vm2, %v1637_v10, 0 }
 0x241   : > { %v1395_v12 = vadd.f32 %v4102_v14, %v1394_v11  ;;  %v1994_v32 = vsel %vm920_vm7, %v1952_v55, %v1743_v45 }
 0x242   : > { %v1396_v34 = vpop.f32.mrf.mxu0  ;;  %1932 = vrot.lane.b32.xlu0 %v1465_v0, %s3324_s10  ;;  %v1887_v52 = vpop.permute.xlu1 %1886 }
 0x243   : > { %v1447_v62 = vmax.f32 %v1395_v12, 0.0  ;;  %v2120_v1 = vsel %vm1052_vm11, %v2088_v20, %v1887_v52 }
 0x244   : > { %v1917_v26 = vpop.permute.xlu0 %1916  ;;  %1806 = vrot.lane.b32.xlu1 %v4382_v37, %s3326_s14 }
 0x245   : > { %v1466_v21 = vpack.c.bf16 %v1447_v62, %v1446_v56  ;;  %v2153_v23 = vsel %vm1085_vm12, %v2120_v1, %v1917_v26 }
 0x246   : > { %1839 = vrot.lane.b32.xlu0 %v1465_v0, %s3323_s9  ;;  %2393 = vmatmul.mubr.bf16.gmra.mxu1 %v2153_v23  ;;  %v1791_v19 = vpop.permute.xlu1 %1790 }
 0x247   : > { %2872 = vmatprep.mubr.msk.bf16.mxu1 %vm920_vm7, %v2200_v5  ;;  %v1555_v38 = vshrl.u32 %v1466_v21, 16  ;;  %v1558_v54 = vshll.u32 %v1466_v21, 16  ;;  %v2026_v51 = vsel %vm953_vm8, %v1994_v32, %v1791_v19 }
 0x248   : > { %v1824_v35 = vpop.permute.xlu0 %1823  ;;  %1872 = vrot.lane.b32.xlu1 %v4400_v17, %s3325_s12 }
 0x249   : > { %v1557_v33 = vrot.slane %v1555_v38, 7  ;;  %v1638_v11 = vrot.slane %v1558_v54, 1  ;;  %v2058_v34 = vsel %vm986_vm9, %v2026_v51, %v1824_v35  ;;  %v2202_v35 = vsel %vm871_vm6, %v4240_v27, %v3911_v31 }
 0x24a   : > { %1715 = vrot.lane.b32.xlu0 %v1465_v0, %s3321_s26  ;;  %v1399_v43 = vpop.f32.mrf.mxu0  ;;  %v1857_v60 = vpop.permute.xlu1 %1856 }
 0x24b   : > { %v1560_v42 = vor.u32 %v1558_v54, %v1557_v33  ;;  %v1400_v46 = vadd.f32 %v4102_v14, %v1399_v43  ;;  %v1639_v20 = vor.u32 %v1638_v11, %v1555_v38  ;;  %v2090_v52 = vsel %vm1019_vm10, %v2058_v34, %v1857_v60 }
 0x24c   : > { %v1700_v24 = vpop.permute.xlu0 %1699  ;;  %v1401_v58 = vpop.f32.mrf.mxu0  ;;  %1760 = vrot.lane.b32.xlu1 %v4400_v17, %s3322_s24 }
 0x24d   : > { %v4412_v63 = vsel %vm3535_vm5, 0, %v1560_v42  ;;  %v1448_v62 = vmax.f32 %v1400_v46, 0.0  ;;  %v4429_v38 = vsel %vm3516_vm2, %v1639_v20, 0  ;;  %v1955_v32 = vsel %vm871_vm6, %v4187_v15, %v1700_v24 }
 0x24e   : > { %1904 = vrot.lane.b32.xlu0 %v4412_v63, %s3327_s6  ;;  %v1402_v0 = vpop.f32.mrf.mxu0  ;;  %v1745_v29 = vpop.permute.xlu1 %1744 }
 0x24f   : > { %v1403_v45 = vadd.f32 %v4102_v14, %v1402_v0  ;;  %v1996_v58 = vsel %vm920_vm7, %v1955_v32, %v1745_v29 }
 0x250   : > { %v1889_v12 = vpop.permute.xlu0 %1888  ;;  %v1404_v56 = vpop.f32.mrf.mxu0  ;;  %1934 = vrot.lane.b32.xlu1 %v1466_v21, %s3324_s10 }
 0x251   : > { %v1449_v1 = vmax.f32 %v1403_v45, 0.0  ;;  %v2122_v26 = vsel %vm1052_vm11, %v2090_v52, %v1889_v12 }
 0x252   : > { %1808 = vrot.lane.b32.xlu0 %v4412_v63, %s3326_s14  ;;  %v1919_v10 = vpop.permute.xlu1 %1918 }
 0x253   : > { %v1467_v23 = vpack.c.bf16 %v1449_v1, %v1448_v62  ;;  %v2156_v19 = vsel %vm1085_vm12, %v2122_v26, %v1919_v10 }
 0x254   : > { %v1793_v5 = vpop.permute.xlu0 %1792  ;;  %1841 = vrot.lane.b32.xlu1 %v1466_v21, %s3323_s9  ;;  %2401 = vmatmul.mubr.bf16.gmra.mxu1 %v2156_v19  ;;  %v2204_v19 = vsel %vm871_vm6, %v4261_v57, %v3943_v59 }
 0x255   : > { %2873 = vmatprep.mubr.msk.bf16.mxu1 %vm920_vm7, %v2202_v35  ;;  %v1562_v33 = vshrl.u32 %v1467_v23, 16  ;;  %v1565_v42 = vshll.u32 %v1467_v23, 16  ;;  %v2028_v27 = vsel %vm953_vm8, %v1996_v58, %v1793_v5 }
 0x256   : > { %1874 = vrot.lane.b32.xlu0 %v4429_v38, %s3325_s12  ;;  %v1826_v54 = vpop.permute.xlu1 %1825 }
 0x257   : > { %v1564_v60 = vrot.slane %v1562_v33, 7  ;;  %v2060_v0 = vsel %vm986_vm9, %v2028_v27, %v1826_v54 }
 0x258   : > { %v1407_v55 = vpop.f32.mrf.mxu0  ;;  %v1859_v43 = vpop.permute.xlu0 %1858  ;;  %1717 = vrot.lane.b32.xlu1 %v1466_v21, %s3321_s26  ;;  %v1640_v21 = vrot.slane %v1565_v42, 1 }
 0x259   : > { %v1567_v31 = vor.u32 %v1565_v42, %v1564_v60  ;;  %v1408_v51 = vadd.f32 %v4102_v14, %v1407_v55  ;;  %v2092_v56 = vsel %vm1019_vm10, %v2060_v0, %v1859_v43 }
 0x25a   : > { %v1409_v11 = vpop.f32.mrf.mxu0  ;;  %1762 = vrot.lane.b32.xlu0 %v4429_v38, %s3322_s24  ;;  %v1702_v46 = vpop.permute.xlu1 %1701  ;;  %v1641_v26 = vor.u32 %v1640_v21, %v1562_v33 }
 0x25b   : > { %v4448_v15 = vsel %vm3535_vm5, 0, %v1567_v31  ;;  %v1450_v34 = vmax.f32 %v1408_v51, 0.0  ;;  %v1958_v42 = vsel %vm871_vm6, %v4207_v48, %v1702_v46 }
 0x25c   : > { %v1410_v45 = vpop.f32.mrf.mxu0  ;;  %v1747_v12 = vpop.permute.xlu0 %1746  ;;  %1906 = vrot.lane.b32.xlu1 %v4448_v15, %s3327_s6  ;;  %v4466_v33 = vsel %vm3516_vm2, %v1641_v26, 0 }
 0x25d   : > { %v1411_v24 = vadd.f32 %v4102_v14, %v1410_v45  ;;  %v1998_v11 = vsel %vm920_vm7, %v1958_v42, %v1747_v12 }
 0x25e   : > { %v1412_v29 = vpop.f32.mrf.mxu0  ;;  %1936 = vrot.lane.b32.xlu0 %v1467_v23, %s3324_s10  ;;  %v1891_v62 = vpop.permute.xlu1 %1890 }
 0x25f   : > { %v1451_v20 = vmax.f32 %v1411_v24, 0.0  ;;  %v2124_v52 = vsel %vm1052_vm11, %v2092_v56, %v1891_v62 }
 0x260   : > { %v1921_v1 = vpop.permute.xlu0 %1920  ;;  %1810 = vrot.lane.b32.xlu1 %v4448_v15, %s3326_s14 }
 0x261   : > { %v1468_v10 = vpack.c.bf16 %v1451_v20, %v1450_v34  ;;  %v2159_v5 = vsel %vm1085_vm12, %v2124_v52, %v1921_v1 }
 0x262   : > { %1843 = vrot.lane.b32.xlu0 %v1467_v23, %s3323_s9  ;;  %2409 = vmatmul.mubr.bf16.gmra.mxu1 %v2159_v5  ;;  %v1795_v35 = vpop.permute.xlu1 %1794 }
 0x263   : > { %2874 = vmatprep.mubr.msk.bf16.mxu1 %vm920_vm7, %v2204_v19  ;;  %v1569_v54 = vshrl.u32 %v1468_v10, 16  ;;  %v1572_v60 = vshll.u32 %v1468_v10, 16  ;;  %v2030_v0 = vsel %vm953_vm8, %v1998_v11, %v1795_v35  ;;  %v2206_v19 = vsel %vm871_vm6, %v4282_v28, %v3978_v36 }
 0x264   : > { %v1828_v55 = vpop.permute.xlu0 %1827  ;;  %1876 = vrot.lane.b32.xlu1 %v4466_v33, %s3325_s12 }
 0x265   : > { %v1571_v43 = vrot.slane %v1569_v54, 7  ;;  %v1642_v51 = vrot.slane %v1572_v60, 1  ;;  %v2062_v21 = vsel %vm986_vm9, %v2030_v0, %v1828_v55 }
 0x266   : > { %1719 = vrot.lane.b32.xlu0 %v1467_v23, %s3321_s26  ;;  %v1415_v59 = vpop.f32.mrf.mxu0  ;;  %v1861_v57 = vpop.permute.xlu1 %1860 }
 0x267   : > { %v1574_v32 = vor.u32 %v1572_v60, %v1571_v43  ;;  %v1416_v48 = vadd.f32 %v4102_v14, %v1415_v59  ;;  %v1643_v29 = vor.u32 %v1642_v51, %v1569_v54  ;;  %v2094_v56 = vsel %vm1019_vm10, %v2062_v21, %v1861_v57 }
 0x268   : > { %v1704_v58 = vpop.permute.xlu0 %1703  ;;  %v1417_v31 = vpop.f32.mrf.mxu0  ;;  %1764 = vrot.lane.b32.xlu1 %v4466_v33, %s3322_s24 }
 0x269   : > { %v4478_v27 = vsel %vm3535_vm5, 0, %v1574_v32  ;;  %v1452_v34 = vmax.f32 %v1416_v48, 0.0  ;;  %v4495_v5 = vsel %vm3516_vm2, %v1643_v29, 0  ;;  %v1961_v42 = vsel %vm871_vm6, %v4229_v7, %v1704_v58 }
 0x26a   : > { %1908 = vrot.lane.b32.xlu0 %v4478_v27, %s3327_s6  ;;  %v1418_v23 = vpop.f32.mrf.mxu0  ;;  %v1749_v46 = vpop.permute.xlu1 %1748 }
 0x26b   : > { %v1419_v45 = vadd.f32 %v4102_v14, %v1418_v23  ;;  %v2000_v59 = vsel %vm920_vm7, %v1961_v42, %v1749_v46 }
 0x26c   : > { %v1893_v12 = vpop.permute.xlu0 %1892  ;;  %v1420_v24 = vpop.f32.mrf.mxu0  ;;  %1938 = vrot.lane.b32.xlu1 %v1468_v10, %s3324_s10 }
 0x26d   : > { %v1453_v20 = vmax.f32 %v1419_v45, 0.0  ;;  %v2126_v62 = vsel %vm1052_vm11, %v2094_v56, %v1893_v12  ;;  %v3164_v24 = vld [vmem:[%s3502_s13 + $0x78] sm:$0xff]  }
 0x26e   : > { %1812 = vrot.lane.b32.xlu0 %v4478_v27, %s3326_s14  ;;  %v1923_v52 = vpop.permute.xlu1 %1922 }
 0x26f   : > { %v1469_v1 = vpack.c.bf16 %v1453_v20, %v1452_v34  ;;  %v2162_v14 = vsel %vm1085_vm12, %v2126_v62, %v1923_v52 }
 0x270   : > { %v1797_v26 = vpop.permute.xlu0 %1796  ;;  %1845 = vrot.lane.b32.xlu1 %v1468_v10, %s3323_s9  ;;  %2417 = vmatmul.mubr.bf16.gmra.mxu1 %v2162_v14  ;;  %v2210_v14 = vsel %vm871_vm6, %v4334_v4, %v4016_v25 }
 0x271   : > { %2875 = vmatprep.mubr.msk.bf16.mxu1 %vm920_vm7, %v2206_v19  ;;  %v1576_v35 = vshrl.u32 %v1469_v1, 16  ;;  %v1579_v60 = vshll.u32 %v1469_v1, 16  ;;  %v2032_v28 = vsel %vm953_vm8, %v2000_v59, %v1797_v26 }
 0x272   : > { %1878 = vrot.lane.b32.xlu0 %v4495_v5, %s3325_s12  ;;  %v1830_v54 = vpop.permute.xlu1 %1829 }
 0x273   : > { %v1578_v43 = vrot.slane %v1576_v35, 7  ;;  %v2064_v32 = vsel %vm986_vm9, %v2032_v28, %v1830_v54  ;;  %v1644_v51 = vrot.slane %v1579_v60, 1 }
 0x274   : > { %v1863_v55 = vpop.permute.xlu0 %1862  ;;  %1721 = vrot.lane.b32.xlu1 %v1468_v10, %s3321_s26 }
 0x275   : > { %v1581_v36 = vor.u32 %v1579_v60, %v1578_v43  ;;  %v2096_v7 = vsel %vm1019_vm10, %v2064_v32, %v1863_v55  ;;  %v1645_v48 = vor.u32 %v1644_v51, %v1576_v35 }
 0x276   : > { %1766 = vrot.lane.b32.xlu0 %v4495_v5, %s3322_s24  ;;  %v1706_v57 = vpop.permute.xlu1 %1705  ;;  %s4698_s24 = scalar_lea.hbm %s4751_s5, %s2955_s8 }
 0x277   : > { %v1613_v31 = vsel %vm3535_vm5, 0, %v1581_v36  ;;  %v4526_v12 = vsel %vm3516_vm2, %v1645_v48, 0  ;;  %v1964_v21 = vsel %vm871_vm6, %v4249_v39, %v1706_v57 }
 0x278   : > { %v1751_v11 = vpop.permute.xlu0 %1750  ;;  %1910 = vrot.lane.b32.xlu1 %v1613_v31, %s3327_s6 }
 0x279   : > { %v2002_v49 = vsel %vm920_vm7, %v1964_v21, %v1751_v11 }
 0x27a   : > { %1940 = vrot.lane.b32.xlu0 %v1469_v1, %s3324_s10  ;;  %v1895_v10 = vpop.permute.xlu1 %1894  ;;  %s2698_s10 = scalar_lea.sflag [#allocation4], %s3496_s30 }
 0x27b   : > { %v2128_v58 = vsel %vm1052_vm11, %v2096_v7, %v1895_v10 }
 0x27c   : > { %v1925_v0 = vpop.permute.xlu0 %1924  ;;  %1814 = vrot.lane.b32.xlu1 %v1613_v31, %s3326_s14  ;;  %s3249_s14 = sshll.u32 %s3328_s22, 4  ;;  %s3250_s14 = int_to_ptr.vmem [resolvable:$false] %s3249_s14 }
 0x27d   : > { %v2165_v23 = vsel %vm1085_vm12, %v2128_v58, %v1925_v0  ;;  %s3251_s6 = scalar_lea.vmem %s3250_s14, 4096  ;;  %p3252_p13 = scmp.lt.s32.totalorder %s4700_s29, %s3250_s14 }
 0x27e   : > { %1847 = vrot.lane.b32.xlu0 %v1469_v1, %s3323_s9  ;;  %2425 = vmatmul.mubr.bf16.gmra.mxu1 %v2165_v23  ;;  %v1799_v46 = vpop.permute.xlu1 %1798 }
 0x27f   : > { %2876 = vmatprep.mubr.msk.bf16.mxu1 %vm920_vm7, %v2208_v13  ;;  %v2034_v6 = vsel %vm953_vm8, %v2002_v49, %v1799_v46 }
 0x280   : > { %v1832_v45 = vpop.permute.xlu0 %1831  ;;  %1880 = vrot.lane.b32.xlu1 %v4526_v12, %s3325_s12  ;;  %s3245_s12 = scalar_lea.vmem %s4700_s29, 2048 }
 0x281   : > { %v2066_v2 = vsel %vm986_vm9, %v2034_v6, %v1832_v45  ;;  %p3246_p5 = scmp.ne.s32.totalorder %s4700_s29, %s3245_s12  ;;  %p3253_p0 = scmp.lt.s32.totalorder %s3251_s6, %s3245_s12 }
 0x282   : > { %1942 = vrot.lane.b32.xlu0 %v3164_v24, %s3321_s26  ;;  %v1865_v29 = vpop.permute.xlu1 %1864 }
 0x283   : > { %v2098_v62 = vsel %vm1019_vm10, %v2066_v2, %v1865_v29  ;;  %p3247_p7 = pnand %p3246_p5, %p4772_p2  ;;  %p3254_p10 = por %p3253_p0, %p3252_p13 }
 0x284   : > { %v1708_v34 = vpop.permute.xlu0 %1707 }
 0x285   : > { %v1967_v54 = vsel %vm871_vm6, %v4271_v47, %v1708_v34  ;;  %v2212_v47 = vsel %vm871_vm6, %v4363_v8, %v4027_v30  ;;  %p3248_p12 = pneg %p3247_p7 }
 0x286   : > { %v1753_v56 = vpop.permute.xlu1 %1752 }
 0x287   : > { %v2004_v55 = vsel %vm920_vm7, %v1967_v54, %v1753_v56  ;;  %p3255_p3 = pnand %p3254_p10, %p3248_p12 }
 0x288   : > { %v1897_v20 = vpop.permute.xlu0 %1896 }
 0x289   : > { %v2130_v52 = vsel %vm1052_vm11, %v2098_v62, %v1897_v20 }
 0x28a   : > { %v1927_v1 = vpop.permute.xlu1 %1926 }
 0x28b   : > { %v2168_v39 = vsel %vm1085_vm12, %v2130_v52, %v1927_v1 }
 0x28c   : > { %v1801_v26 = vpop.permute.xlu0 %1800  ;;  %2433 = vmatmul.mubr.bf16.gmra.mxu1 %v2168_v39 }
 0x28d   : > { %2877 = vmatprep.mubr.msk.bf16.mxu1 %vm920_vm7, %v2210_v14  ;;  %v2036_v43 = vsel %vm953_vm8, %v2004_v55, %v1801_v26 }
 0x28e   : > { %v1834_v19 = vpop.permute.xlu1 %1833 }
 0x28f   : > { %v2068_v42 = vsel %vm986_vm9, %v2036_v43, %v1834_v19 }
 0x290   : > { %v1867_v35 = vpop.permute.xlu0 %1866 }
 0x291   : > { %v2100_v36 = vsel %vm1019_vm10, %v2068_v42, %v1867_v35 }
 0x292   : > { %v1710_v60 = vpop.permute.xlu1 %1709 }
 0x293   : > { %v1970_v31 = vsel %vm871_vm6, %v4291_v40, %v1710_v60  ;;  %v2214_v40 = vsel %vm871_vm6, %v4400_v17, %v4042_v53 }
 0x294   : > { %v1755_v59 = vpop.permute.xlu0 %1754 }
 0x295   : > { %v2006_v10 = vsel %vm920_vm7, %v1970_v31, %v1755_v59 }
 0x296   : > { %v1899_v28 = vpop.permute.xlu1 %1898 }
 0x297   : > { %v2132_v25 = vsel %vm1052_vm11, %v2100_v36, %v1899_v28 }
 0x298   : > { %v1929_v4 = vpop.permute.xlu0 %1928 }
 0x299   : > { %v2171_v57 = vsel %vm1085_vm12, %v2132_v25, %v1929_v4 }
 0x29a   : > { %2441 = vmatmul.mubr.bf16.gmra.mxu1 %v2171_v57  ;;  %v1803_v32 = vpop.permute.xlu1 %1802 }
 0x29b   : > { %2878 = vmatprep.mubr.msk.bf16.mxu1 %vm920_vm7, %v2212_v47  ;;  %v2038_v58 = vsel %vm953_vm8, %v2006_v10, %v1803_v32 }
 0x29c   : > { %v1836_v11 = vpop.permute.xlu0 %1835 }
 0x29d   : > { %v2070_v23 = vsel %vm986_vm9, %v2038_v58, %v1836_v11 }
 0x29e   : > { %v1869_v51 = vpop.permute.xlu1 %1868 }
 0x29f   : > { %v2102_v13 = vsel %vm1019_vm10, %v2070_v23, %v1869_v51 }
 0x2a0   : > { %v1712_v7 = vpop.permute.xlu0 %1711 }
 0x2a1   : > { %v1973_v29 = vsel %vm871_vm6, %v4315_v41, %v1712_v7  ;;  %v2216_v41 = vsel %vm871_vm6, %v4429_v38, %v4053_v9 }
 0x2a2   : > { %v1757_v0 = vpop.permute.xlu1 %1756 }
 0x2a3   : > { %v2008_v34 = vsel %vm920_vm7, %v1973_v29, %v1757_v0 }
 0x2a4   : > { %v1901_v48 = vpop.permute.xlu0 %1900 }
 0x2a5   : > { %v2134_v30 = vsel %vm1052_vm11, %v2102_v13, %v1901_v48 }
 0x2a6   : > { %v1931_v8 = vpop.permute.xlu1 %1930 }
 0x2a7   : > { %v2174_v45 = vsel %vm1085_vm12, %v2134_v30, %v1931_v8 }
 0x2a8   : > { %v1805_v46 = vpop.permute.xlu0 %1804  ;;  %2449 = vmatmul.mubr.bf16.gmra.mxu1 %v2174_v45 }
 0x2a9   : > { %2879 = vmatprep.mubr.msk.bf16.mxu1 %vm920_vm7, %v2214_v40  ;;  %v2040_v49 = vsel %vm953_vm8, %v2008_v34, %v1805_v46 }
 0x2aa   : > { %v1838_v21 = vpop.permute.xlu1 %1837 }
 0x2ab   : > { %v2072_v56 = vsel %vm986_vm9, %v2040_v49, %v1838_v21 }
 0x2ac   : > { %v1871_v24 = vpop.permute.xlu0 %1870 }
 0x2ad   : > { %v2104_v2 = vsel %vm1019_vm10, %v2072_v56, %v1871_v24 }
 0x2ae   : > { %v1714_v6 = vpop.permute.xlu1 %1713 }
 0x2af   : > { %v1976_v39 = vsel %vm871_vm6, %v4346_v18, %v1714_v6  ;;  %v2218_v18 = vsel %vm871_vm6, %v4466_v33, %v4068_v61 }
 0x2b0   : > { %v1759_v20 = vpop.permute.xlu0 %1758 }
 0x2b1   : > { %v2010_v35 = vsel %vm920_vm7, %v1976_v39, %v1759_v20 }
 0x2b2   : > { %v1903_v62 = vpop.permute.xlu1 %1902 }
 0x2b3   : > { %v2136_v53 = vsel %vm1052_vm11, %v2104_v2, %v1903_v62 }
 0x2b4   : > { %v1933_v17 = vpop.permute.xlu0 %1932 }
 0x2b5   : > { %v2177_v52 = vsel %vm1085_vm12, %v2136_v53, %v1933_v17  ;;  %v4624_v17 = vld [vmem:[%s4750_s4] ss:$0 sm:$0xff] }
 0x2b6   : > { %2457 = vmatmul.mubr.bf16.gmra.mxu1 %v2177_v52  ;;  %v1807_v1 = vpop.permute.xlu1 %1806 }
 0x2b7   : > { %2880 = vmatprep.mubr.msk.bf16.mxu1 %vm920_vm7, %v2216_v41  ;;  %v2042_v54 = vsel %vm953_vm8, %v2010_v35, %v1807_v1 }
 0x2b8   : > { %v1840_v26 = vpop.permute.xlu0 %1839 }
 0x2b9   : > { %v2074_v60 = vsel %vm986_vm9, %v2042_v54, %v1840_v26 }
 0x2ba   : > { %v1873_v14 = vpop.permute.xlu1 %1872 }
 0x2bb   : > { %v2106_v42 = vsel %vm1019_vm10, %v2074_v60, %v1873_v14 }
 0x2bc   : > { %v1716_v19 = vpop.permute.xlu0 %1715 }
 0x2bd   : > { %v1979_v4 = vsel %vm871_vm6, %v4382_v37, %v1716_v19  ;;  %v2220_v37 = vsel %vm871_vm6, %v4495_v5, %v4080_v50 }
 0x2be   : > { %v1761_v55 = vpop.permute.xlu1 %1760 }
 0x2bf   : > { %v2012_v57 = vsel %vm920_vm7, %v1979_v4, %v1761_v55 }
 0x2c0   : > { %v1905_v43 = vpop.permute.xlu0 %1904 }
 0x2c1   : > { %v2138_v9 = vsel %vm1052_vm11, %v2106_v42, %v1905_v43 }
 0x2c2   : > { %v1935_v38 = vpop.permute.xlu1 %1934 }
 0x2c3   : > { %v2180_v36 = vsel %vm1085_vm12, %v2138_v9, %v1935_v38 }
 0x2c4   : > { %v1809_v59 = vpop.permute.xlu0 %1808  ;;  %2465 = vmatmul.mubr.bf16.gmra.mxu1 %v2180_v36 }
 0x2c5   : > { %2881 = vmatprep.mubr.msk.bf16.mxu1 %vm920_vm7, %v2218_v18  ;;  %v2044_v47 = vsel %vm953_vm8, %v2012_v57, %v1809_v59 }
 0x2c6   : > { %v1842_v28 = vpop.permute.xlu1 %1841 }
 0x2c7   : > { %v2076_v11 = vsel %vm986_vm9, %v2044_v47, %v1842_v28 }
 0x2c8   : > { %v1875_v25 = vpop.permute.xlu0 %1874 }
 0x2c9   : > { %v2108_v51 = vsel %vm1019_vm10, %v2076_v11, %v1875_v25 }
 0x2ca   : > { %v1718_v32 = vpop.permute.xlu1 %1717 }
 0x2cb   : > { %v1982_v48 = vsel %vm871_vm6, %v4412_v63, %v1718_v32  ;;  %v2222_v63 = vsel %vm871_vm6, %v4526_v12, %v4105_v16 }
 0x2cc   : > { %v1763_v31 = vpop.permute.xlu0 %1762 }
 0x2cd   : > { %v2014_v30 = vsel %vm920_vm7, %v1982_v48, %v1763_v31 }
 0x2ce   : > { %v1907_v7 = vpop.permute.xlu1 %1906 }
 0x2cf   : > { %v2140_v61 = vsel %vm1052_vm11, %v2108_v51, %v1907_v7 }
 0x2d0   : > { %v1937_v33 = vpop.permute.xlu0 %1936 }
 0x2d1   : > { %v2183_v10 = vsel %vm1085_vm12, %v2140_v61, %v1937_v33 }
 0x2d2   : > { %2473 = vmatmul.mubr.bf16.gmra.mxu1 %v2183_v10  ;;  %v1811_v58 = vpop.permute.xlu1 %1810 }
 0x2d3   : > { %2882 = vmatprep.mubr.msk.bf16.mxu1 %vm920_vm7, %v2220_v37  ;;  %v2046_v8 = vsel %vm953_vm8, %v2014_v30, %v1811_v58 }
 0x2d4   : > { %v1844_v0 = vpop.permute.xlu0 %1843 }
 0x2d5   : > { %v2078_v40 = vsel %vm986_vm9, %v2046_v8, %v1844_v0 }
 0x2d6   : > { %v1877_v23 = vpop.permute.xlu1 %1876 }
 0x2d7   : > { %v2110_v21 = vsel %vm1019_vm10, %v2078_v40, %v1877_v23 }
 0x2d8   : > { %v1720_v13 = vpop.permute.xlu0 %1719 }
 0x2d9   : > { %v1985_v6 = vsel %vm871_vm6, %v4448_v15, %v1720_v13 }
 0x2da   : > { %v1765_v46 = vpop.permute.xlu1 %1764 }
 0x2db   : > { %v2016_v56 = vsel %vm920_vm7, %v1985_v6, %v1765_v46 }
 0x2dc   : > { %v1909_v45 = vpop.permute.xlu0 %1908 }
 0x2dd   : > { %v2142_v50 = vsel %vm1052_vm11, %v2110_v21, %v1909_v45 }
 0x2de   : > { %v1939_v5 = vpop.permute.xlu1 %1938 }
 0x2df   : > { %v2186_v29 = vsel %vm1085_vm12, %v2142_v50, %v1939_v5 }
 0x2e0   : > { %v1813_v24 = vpop.permute.xlu0 %1812  ;;  %2481 = vmatmul.mubr.bf16.gmra.mxu1 %v2186_v29 }
 0x2e1   : > { %2883 = vmatprep.mubr.msk.bf16.mxu1 %vm920_vm7, %v2222_v63  ;;  %v2048_v20 = vsel %vm953_vm8, %v2016_v56, %v1813_v24 }
 0x2e2   : > { %v1846_v34 = vpop.permute.xlu1 %1845 }
 0x2e3   : > { %v2080_v62 = vsel %vm986_vm9, %v2048_v20, %v1846_v34 }
 0x2e4   : > { %v1879_v49 = vpop.permute.xlu0 %1878 }
 0x2e5   : > { %v2112_v12 = vsel %vm1019_vm10, %v2080_v62, %v1879_v49 }
 0x2e6   : > { %v1722_v2 = vpop.permute.xlu1 %1721 }
 0x2e7   : > { %v1988_v15 = vsel %vm871_vm6, %v4478_v27, %v1722_v2 }
 0x2e8   : > { %v1767_v53 = vpop.permute.xlu0 %1766 }
 0x2e9   : > { %v2378_v16 = vpop.f32.mrf.mxu1  ;;  %v2018_v35 = vsel %vm920_vm7, %v1988_v15, %v1767_v53 }
 0x2ea   : > { %v1911_v52 = vpop.permute.xlu1 %1910  ;;  %v2379_v39 = vadd.f32 %v4624_v17, %v2378_v16 }
 0x2eb   : > { %v2144_v41 = vsel %vm1052_vm11, %v2112_v12, %v1911_v52  ;;  %v2380_v26 = vpop.f32.mrf.mxu1 }
 0x2ec   : > { %v1941_v1 = vpop.permute.xlu0 %1940  ;;  %v2505_v42 = vmax.f32 %v2379_v39, 0.0 }
 0x2ed   : > { %v2189_v14 = vsel %vm1085_vm12, %v2144_v41, %v1941_v1  ;;  %v2381_v19 = vpop.f32.mrf.mxu1 }
 0x2ee   : > { %2489 = vmatmul.mubr.bf16.gmra.mxu1 %v2189_v14  ;;  %v2382_v54 = vadd.f32 %v4624_v17, %v2381_v19  ;;  %v1815_v55 = vpop.permute.xlu1 %1814 }
 0x2ef   : > { %v2050_v43 = vsel %vm953_vm8, %v2018_v35, %v1815_v55  ;;  %v2383_v27 = vpop.f32.mrf.mxu1 }
 0x2f0   : > { %v1848_v60 = vpop.permute.xlu0 %1847  ;;  %v2506_v9 = vmax.f32 %v2382_v54, 0.0 }
 0x2f1   : > { %v2082_v59 = vsel %vm986_vm9, %v2050_v43, %v1848_v60 }
 0x2f2   : > { %v2959_v38 = vpack.c.bf16 %v2506_v9, %v2505_v42  ;;  %v1881_v36 = vpop.permute.xlu1 %1880 }
 0x2f3   : > { %v2114_v18 = vsel %vm1019_vm10, %v2082_v59, %v1881_v36 }
 0x2f4   : > { %v1943_v28 = vpop.permute.xlu0 %1942  ;;  %2960 = vst [vmem:[%s4639_s16] sm:$0xff] %v2959_v38   ;;  %v2145_v4 = vsel %vm1052_vm11, %v2114_v18, %v4120_v44 }
 0x2f5   : > { %v2224_v25 = vsel %vm871_vm6, %v3523_v3, %v1943_v28  ;;  %v2191_v57 = vsel %vm1085_vm12, %v2145_v4, %v4126_v22 }
 0x2f6   : > { %2884 = vmatprep.mubr.msk.bf16.mxu1 %vm920_vm7, %v2224_v25 }
 0x2f7   : > { %2497 = vmatmul.mubr.bf16.gmra.mxu1 %v2191_v57 }
 0x2f8   : > { %v2386_v47 = vpop.f32.mrf.mxu1 }
 0x2f9   : > { %v2387_v11 = vadd.f32 %v4624_v17, %v2386_v47 }
 0x2fa   : > { %v2388_v32 = vpop.f32.mrf.mxu1 }
 0x2fb   : > { %v2507_v61 = vmax.f32 %v2387_v11, 0.0 }
 0x2fc   : > { %v2389_v31 = vpop.f32.mrf.mxu1 }
 0x2fd   : > { %v2390_v51 = vadd.f32 %v4624_v17, %v2389_v31 }
 0x2fe   : > { %v2391_v7 = vpop.f32.mrf.mxu1 }
 0x2ff   : > { %v2508_v3 = vmax.f32 %v2390_v51, 0.0 }
 0x301   : > { %v2964_v33 = vpack.c.bf16 %v2508_v3, %v2507_v61 }
 0x303   : > { %3036 = vst [vmem:[%s4639_s16 + $0x8] sm:$0xff] %v2964_v33  }
 0x306   : > { %v2394_v44 = vpop.f32.mrf.mxu1 }
 0x307   : > { %v2395_v37 = vadd.f32 %v4624_v17, %v2394_v44 }
 0x308   : > { %v2396_v10 = vpop.f32.mrf.mxu1 }
 0x309   : > { %v2509_v48 = vmax.f32 %v2395_v37, 0.0 }
 0x30a   : > { %v2397_v58 = vpop.f32.mrf.mxu1 }
 0x30b   : > { %v2398_v22 = vadd.f32 %v4624_v17, %v2397_v58 }
 0x30c   : > { %v2399_v0 = vpop.f32.mrf.mxu1 }
 0x30d   : > { %v2510_v23 = vmax.f32 %v2398_v22, 0.0 }
 0x30f   : > { %v2969_v13 = vpack.c.bf16 %v2510_v23, %v2509_v48 }
 0x311   : > { %3037 = vst [vmem:[%s4639_s16 + $0x10] sm:$0xff] %v2969_v13  }
 0x314   : > { %v2402_v30 = vpop.f32.mrf.mxu1 }
 0x315   : > { %v2403_v46 = vadd.f32 %v4624_v17, %v2402_v30 }
 0x316   : > { %v2404_v8 = vpop.f32.mrf.mxu1 }
 0x317   : > { %v2511_v50 = vmax.f32 %v2403_v46, 0.0 }
 0x318   : > { %v2405_v45 = vpop.f32.mrf.mxu1 }
 0x319   : > { %v2406_v40 = vadd.f32 %v4624_v17, %v2405_v45 }
 0x31a   : > { %v2407_v21 = vpop.f32.mrf.mxu1 }
 0x31b   : > { %v2512_v5 = vmax.f32 %v2406_v40, 0.0 }
 0x31d   : > { %v2974_v24 = vpack.c.bf16 %v2512_v5, %v2511_v50 }
 0x31f   : > { %3038 = vst [vmem:[%s4639_s16 + $0x18] sm:$0xff] %v2974_v24  }
 0x322   : > { %v2410_v29 = vpop.f32.mrf.mxu1 }
 0x323   : > { %v2411_v34 = vadd.f32 %v4624_v17, %v2410_v29 }
 0x324   : > { %v2412_v63 = vpop.f32.mrf.mxu1 }
 0x325   : > { %v2513_v20 = vmax.f32 %v2411_v34, 0.0 }
 0x326   : > { %v2413_v49 = vpop.f32.mrf.mxu1 }
 0x327   : > { %v2414_v6 = vadd.f32 %v4624_v17, %v2413_v49 }
 0x328   : > { %v2415_v56 = vpop.f32.mrf.mxu1 }
 0x329   : > { %v2514_v2 = vmax.f32 %v2414_v6, 0.0 }
 0x32b   : > { %v2979_v62 = vpack.c.bf16 %v2514_v2, %v2513_v20 }
 0x32d   : > { %3039 = vst [vmem:[%s4639_s16 + $0x20] sm:$0xff] %v2979_v62  }
 0x330   : > { %v2418_v53 = vpop.f32.mrf.mxu1 }
 0x331   : > { %v2419_v12 = vadd.f32 %v4624_v17, %v2418_v53 }
 0x332   : > { %v2420_v16 = vpop.f32.mrf.mxu1 }
 0x333   : > { %v2515_v1 = vmax.f32 %v2419_v12, 0.0 }
 0x334   : > { %v2421_v52 = vpop.f32.mrf.mxu1 }
 0x335   : > { %v2422_v15 = vadd.f32 %v4624_v17, %v2421_v52 }
 0x336   : > { %v2423_v41 = vpop.f32.mrf.mxu1 }
 0x337   : > { %v2516_v26 = vmax.f32 %v2422_v15, 0.0 }
 0x339   : > { %v2984_v39 = vpack.c.bf16 %v2516_v26, %v2515_v1 }
 0x33b   : > { %3040 = vst [vmem:[%s4639_s16 + $0x28] sm:$0xff] %v2984_v39  }
 0x33e   : > { %v2426_v14 = vpop.f32.mrf.mxu1 }
 0x33f   : > { %v2427_v35 = vadd.f32 %v4624_v17, %v2426_v14 }
 0x340   : > { %v2428_v19 = vpop.f32.mrf.mxu1 }
 0x341   : > { %v2517_v60 = vmax.f32 %v2427_v35, 0.0 }
 0x342   : > { %v2429_v54 = vpop.f32.mrf.mxu1 }
 0x343   : > { %v2430_v55 = vadd.f32 %v4624_v17, %v2429_v54 }
 0x344   : > { %v2431_v43 = vpop.f32.mrf.mxu1 }
 0x345   : > { %v2518_v27 = vmax.f32 %v2430_v55, 0.0 }
 0x347   : > { %v2989_v42 = vpack.c.bf16 %v2518_v27, %v2517_v60 }
 0x349   : > { %3041 = vst [vmem:[%s4639_s16 + $0x30] sm:$0xff] %v2989_v42  }
 0x34c   : > { %v2434_v9 = vpop.f32.mrf.mxu1 }
 0x34d   : > { %v2435_v59 = vadd.f32 %v4624_v17, %v2434_v9 }
 0x34e   : > { %v2436_v38 = vpop.f32.mrf.mxu1 }
 0x34f   : > { %v2519_v25 = vmax.f32 %v2435_v59, 0.0 }
 0x350   : > { %v2437_v36 = vpop.f32.mrf.mxu1 }
 0x351   : > { %v2438_v18 = vadd.f32 %v4624_v17, %v2437_v36 }
 0x352   : > { %v2439_v28 = vpop.f32.mrf.mxu1 }
 0x353   : > { %v2520_v4 = vmax.f32 %v2438_v18, 0.0 }
 0x355   : > { %v2994_v57 = vpack.c.bf16 %v2520_v4, %v2519_v25 }
 0x357   : > { %3042 = vst [vmem:[%s4639_s16 + $0x38] sm:$0xff] %v2994_v57  }
 0x35a   : > { %v2442_v47 = vpop.f32.mrf.mxu1 }
 0x35b   : > { %v2443_v11 = vadd.f32 %v4624_v17, %v2442_v47 }
 0x35c   : > { %v2444_v32 = vpop.f32.mrf.mxu1 }
 0x35d   : > { %v2521_v61 = vmax.f32 %v2443_v11, 0.0 }
 0x35e   : > { %v2445_v31 = vpop.f32.mrf.mxu1 }
 0x35f   : > { %v2446_v51 = vadd.f32 %v4624_v17, %v2445_v31 }
 0x360   : > { %v2447_v7 = vpop.f32.mrf.mxu1 }
 0x361   : > { %v2522_v3 = vmax.f32 %v2446_v51, 0.0 }
 0x363   : > { %v2999_v33 = vpack.c.bf16 %v2522_v3, %v2521_v61 }
 0x365   : > { %3043 = vst [vmem:[%s4639_s16 + $0x40] sm:$0xff] %v2999_v33  }
 0x368   : > { %v2450_v44 = vpop.f32.mrf.mxu1 }
 0x369   : > { %v2451_v37 = vadd.f32 %v4624_v17, %v2450_v44 }
 0x36a   : > { %v2452_v10 = vpop.f32.mrf.mxu1 }
 0x36b   : > { %v2523_v48 = vmax.f32 %v2451_v37, 0.0 }
 0x36c   : > { %v2453_v58 = vpop.f32.mrf.mxu1 }
 0x36d   : > { %v2454_v22 = vadd.f32 %v4624_v17, %v2453_v58 }
 0x36e   : > { %v2455_v0 = vpop.f32.mrf.mxu1 }
 0x36f   : > { %v2524_v23 = vmax.f32 %v2454_v22, 0.0 }
 0x371   : > { %v3004_v13 = vpack.c.bf16 %v2524_v23, %v2523_v48 }
 0x373   : > { %3044 = vst [vmem:[%s4639_s16 + $0x48] sm:$0xff] %v3004_v13  }
 0x376   : > { %v2458_v30 = vpop.f32.mrf.mxu1 }
 0x377   : > { %v2459_v46 = vadd.f32 %v4624_v17, %v2458_v30 }
 0x378   : > { %v2460_v8 = vpop.f32.mrf.mxu1 }
 0x379   : > { %v2525_v50 = vmax.f32 %v2459_v46, 0.0 }
 0x37a   : > { %v2461_v45 = vpop.f32.mrf.mxu1 }
 0x37b   : > { %v2462_v40 = vadd.f32 %v4624_v17, %v2461_v45 }
 0x37c   : > { %v2463_v21 = vpop.f32.mrf.mxu1 }
 0x37d   : > { %v2526_v5 = vmax.f32 %v2462_v40, 0.0 }
 0x37f   : > { %v3009_v24 = vpack.c.bf16 %v2526_v5, %v2525_v50 }
 0x381   : > { %3045 = vst [vmem:[%s4639_s16 + $0x50] sm:$0xff] %v3009_v24  }
 0x384   : > { %v2466_v29 = vpop.f32.mrf.mxu1 }
 0x385   : > { %v2467_v34 = vadd.f32 %v4624_v17, %v2466_v29 }
 0x386   : > { %v2468_v63 = vpop.f32.mrf.mxu1 }
 0x387   : > { %v2527_v20 = vmax.f32 %v2467_v34, 0.0 }
 0x388   : > { %v2469_v49 = vpop.f32.mrf.mxu1 }
 0x389   : > { %v2470_v6 = vadd.f32 %v4624_v17, %v2469_v49 }
 0x38a   : > { %v2471_v56 = vpop.f32.mrf.mxu1 }
 0x38b   : > { %v2528_v2 = vmax.f32 %v2470_v6, 0.0 }
 0x38d   : > { %v3014_v62 = vpack.c.bf16 %v2528_v2, %v2527_v20 }
 0x38f   : > { %3046 = vst [vmem:[%s4639_s16 + $0x58] sm:$0xff] %v3014_v62  }
 0x392   : > { %v2474_v53 = vpop.f32.mrf.mxu1 }
 0x393   : > { %v2475_v12 = vadd.f32 %v4624_v17, %v2474_v53 }
 0x394   : > { %v2476_v16 = vpop.f32.mrf.mxu1 }
 0x395   : > { %v2529_v1 = vmax.f32 %v2475_v12, 0.0 }
 0x396   : > { %v2477_v52 = vpop.f32.mrf.mxu1 }
 0x397   : > { %v2478_v15 = vadd.f32 %v4624_v17, %v2477_v52 }
 0x398   : > { %v2479_v41 = vpop.f32.mrf.mxu1 }
 0x399   : > { %v2530_v26 = vmax.f32 %v2478_v15, 0.0 }
 0x39b   : > { %v3019_v39 = vpack.c.bf16 %v2530_v26, %v2529_v1 }
 0x39d   : > { %3047 = vst [vmem:[%s4639_s16 + $0x60] sm:$0xff] %v3019_v39  }
 0x3a0   : > { %v2482_v14 = vpop.f32.mrf.mxu1 }
 0x3a1   : > { %v2483_v35 = vadd.f32 %v4624_v17, %v2482_v14 }
 0x3a2   : > { %v2484_v19 = vpop.f32.mrf.mxu1 }
 0x3a3   : > { %v2531_v60 = vmax.f32 %v2483_v35, 0.0 }
 0x3a4   : > { %v2485_v54 = vpop.f32.mrf.mxu1 }
 0x3a5   : > { %v2486_v55 = vadd.f32 %v4624_v17, %v2485_v54 }
 0x3a6   : > { %v2487_v43 = vpop.f32.mrf.mxu1 }
 0x3a7   : > { %v2532_v27 = vmax.f32 %v2486_v55, 0.0 }
 0x3a9   : > { %v3024_v42 = vpack.c.bf16 %v2532_v27, %v2531_v60 }
 0x3ab   : > { %3048 = vst [vmem:[%s4639_s16 + $0x68] sm:$0xff] %v3024_v42  }
 0x3ae   : > { %v2490_v9 = vpop.f32.mrf.mxu1 }
 0x3af   : > { %v2491_v59 = vadd.f32 %v4624_v17, %v2490_v9 }
 0x3b0   : > { %v2492_v38 = vpop.f32.mrf.mxu1 }
 0x3b1   : > { %v2533_v25 = vmax.f32 %v2491_v59, 0.0 }
 0x3b2   : > { %v2493_v36 = vpop.f32.mrf.mxu1 }
 0x3b3   : > { %v2494_v18 = vadd.f32 %v4624_v17, %v2493_v36 }
 0x3b4   : > { %v2495_v28 = vpop.f32.mrf.mxu1 }
 0x3b5   : > { %v2534_v4 = vmax.f32 %v2494_v18, 0.0 }
 0x3b7   : > { %v3029_v57 = vpack.c.bf16 %v2534_v4, %v2533_v25  ;;  %v2498_v47 = vpop.f32.mrf.mxu1 }
 0x3b8   : > { %v2499_v11 = vadd.f32 %v4624_v17, %v2498_v47 }
 0x3b9   : > { %3049 = vst [vmem:[%s4639_s16 + $0x70] sm:$0xff] %v3029_v57   ;;  %v2500_v32 = vpop.f32.mrf.mxu1 }
 0x3ba   : > { %v2535_v61 = vmax.f32 %v2499_v11, 0.0 }
 0x3bb   : > { %v2501_v31 = vpop.f32.mrf.mxu1 }
 0x3bc   : > { %v2502_v51 = vadd.f32 %v4624_v17, %v2501_v31 }
 0x3bd   : > { %v2503_v7 = vpop.f32.mrf.mxu1 }
 0x3be   : > { %v2536_v3 = vmax.f32 %v2502_v51, 0.0 }
 0x3c0   : > { %v3034_v33 = vpack.c.bf16 %v2536_v3, %v2535_v61 }
 0x3c2   : > { %3050 = vst [vmem:[%s4639_s16 + $0x78] sm:$0xff] %v3034_v33  }
 0x3c3   : > { %3258 = shalt.err (!%p3255_p3)
}
 0x3c4   : > { %s3259_s7 = scalar_lea.hbm %s4698_s24, 2048  ;;  %s3263_s17 = scalar_lea.hbm %s4751_s5, 4096 }
 0x3c5   : > { %p3260_p11 = scmp.ne.s32.totalorder %s4698_s24, %s3259_s7  ;;  %p3264_p4 = scmp.lt.s32.totalorder %s4698_s24, %s4751_s5 }
 0x3c6   : > { %p3265_p6 = scmp.lt.s32.totalorder %s3263_s17, %s3259_s7 }
 0x3c7   : > { %p3261_p9 = pnand %p3260_p11, %p4772_p2 }
 0x3c8   : > { %p3266_p8 = por %p3265_p6, %p3264_p4 }
 0x3c9   : > { %p3262_p1 = pneg %p3261_p9 }
 0x3cb   : > { %p3267_p5 = pnand %p3266_p8, %p3262_p1 }
 0x3cd   : > { %3270 = shalt.err (!%p3267_p5)
}
 0x3ce   : > { %s3329_s13 = smov 4  }
 0x3cf   : > { %3061 = dma.vmem_to_hbm [thread:$0]  (%p4772_p2), %s4700_s29, 2048, %s4698_s24, %s2698_s10, %s3323_s9, %s3323_s9, %s3329_s13  }
 0x3d0 PF: > { %s2726_s26 = sand.u32 1, %s3301_s18   ;;  %p4773_p7 = scmp.ne.s32.totalorder %s4758_s25, 0 }
 0x3d1   : > { %p4774_p12 = scmp.ge.s32.totalorder %s3313_s21, 2  ;;  %s2727_s12 = scalar_lea.sflag [#allocation4], %s2726_s26 }
 0x3d3   : > { %p3075_p13 = pnand %p4774_p12, %p4773_p7 }
 0x3d5   : > { %p3076_p0 = pneg %p3075_p13 }
 0x3d7   : > { %3296 = dma.done.wait (%p3076_p0), %s2727_s12, 2048  }
 0x3d8   : > { %3298 = vsyncadd (%p3076_p0), %s2727_s12, 4294965248  ;;  %p19_p10 = scmp.ge.s32.totalorder %s3438_s15, 4   ;;  %s4775_s18 = smov %s3305_s19 }
 0x3d9   : > { %s4776_s19 = smov %s3309_s20  ;;  %s4777_s20 = smov %s3454_s27 }
 0x3da   : > { %s4778_s21 = smov %s3438_s15  ;;  %21 = sbr.rel (!%p19_p10) target bundleno = 6 (0x6), region = 93 }
 0x3df   :  { %2732 = vsyncpa [#allocation3], 1 }
 0x3e0   :  { %2734 = vsyncpa [#allocation3 + $0x1], 1 }
 0x3e1   :  { %2735 = vsyncpa [#allocation6], 1 }
 0x3e2   :  { %2736 = vsyncpa [#allocation4], 1 }
 0x3e3   :  { %2738 = vsyncpa [#allocation4 + $0x1], 1 }

</bundles_post_ra>
